<compile_context>
chip_gen: v6e
topology: v6e:2x2x1
jax: 0.10.0
libtpu: 0.0.40
codegen_flags: <defaults>
</compile_context>

<pallas_src>
import functools

import jax
import jax.numpy as jnp
from jax.experimental import pallas as pl
from jax.experimental.pallas import tpu as pltpu


def _round_up(x, m):
    return (x + m - 1) // m * m


# ----------------------------------------------------------------------------
# Kernel 1: im2col Conv3d tile + fused BN-statistics epilogue.
# ----------------------------------------------------------------------------
def _conv3d_im2col_kernel(xa_ref, xb_ref, w_ref, mask_ref, o_ref, stats_ref,
                          xcat_ref, col_ref, *, tap_offsets):
    # xa_ref, xb_ref: (1, Cin, T) two consecutive T-wide windows of the
    #                 flattened padded input; together they cover the
    #                 [p0, p0 + 2T) halo window needed by all 27 taps.
    # w_ref:          (Cout, 27*Cin) im2col weight matrix.
    # mask_ref:       (1, T) 1.0 where the flat position is a valid output.
    # o_ref:          (1, Cout, T) conv output tile (spatial on lanes).
    # stats_ref:      (1, 1, Cout, 2) per-tile [sum, sum_sq] for BatchNorm.
    # xcat_ref:       (Cin, 2T) VMEM staging of [xa | xb].
    # col_ref:        (27*Cin, T) VMEM im2col matrix.
    cin = xa_ref.shape[1]
    t = xa_ref.shape[2]

    xcat_ref[:, 0:t] = xa_ref[0]
    xcat_ref[:, t:2 * t] = xb_ref[0]

    # im2col: every tap is a constant (static) lane offset of the flat window.
    for k, off in enumerate(tap_offsets):            # static unroll, 27 taps
        col_ref[k * cin:(k + 1) * cin, :] = xcat_ref[:, off:off + t]

    # Single MXU contraction over K^3*Cin (=108 for Cin=4), f32 accumulation.
    y = jnp.dot(w_ref[...], col_ref[...],
                preferred_element_type=jnp.float32)            # (Cout, T)
    o_ref[0] = y.astype(o_ref.dtype)

    # Fused BN statistics over the valid positions of this tile.
    m = mask_ref[...]                                          # (1, T)
    ym = y * m
    s = jnp.sum(ym, axis=1, keepdims=True)                     # (Cout, 1)
    ss = jnp.sum(ym * y, axis=1, keepdims=True)                # (Cout, 1)
    stats_ref[0, 0] = jnp.concatenate([s, ss], axis=1)         # (Cout, 2)


# ----------------------------------------------------------------------------
# Kernel 2: BatchNorm affine + ReLU, tiled elementwise pass.
# ----------------------------------------------------------------------------
def _bn_relu_kernel(y_ref, scale_ref, shift_ref, o_ref):
    # y_ref: (1, Cout, T); scale/shift: (Cout, 1) per-channel affine params.
    y = y_ref[0]
    o_ref[0] = jnp.maximum(y * scale_ref[...] + shift_ref[...],
                           0.0).astype(o_ref.dtype)


# ----------------------------------------------------------------------------
# Wrapper: layout prep, pallas_calls, BN affine from fused statistics.
# ----------------------------------------------------------------------------
def conv_bn_relu_3d(x_ncdhw, weight_oidhw, gamma, beta, *, eps=1e-5,
                    tile=512, use_bf16=False):
    """Conv3d(k=3, s=1, p=1, bias=False) -> BatchNorm3d(train) -> ReLU."""
    N, Cin, D, H, W = x_ncdhw.shape
    Cout, Cin_w, K, K2, K3 = weight_oidhw.shape
    assert Cin_w == Cin and K == K2 == K3 == 3, "kernel_size=3, stride=1 only"
    pad = 1
    Dp, Hp, Wp = D + 2 * pad, H + 2 * pad, W + 2 * pad
    HpWp = Hp * Wp

    # Flat padded-stride indexing: output voxel (d, h, w) sits at
    # p = d*Hp*Wp + h*Wp + w and tap (kd, kh, kw) reads the padded input at
    # p + kd*Hp*Wp + kh*Wp + kw  ->  all 27 taps are constant flat offsets.
    tap_offsets = tuple(kd * HpWp + kh * Wp + kw
                        for kd in range(K) for kh in range(K) for kw in range(K))
    max_off = tap_offsets[-1]

    T = _round_up(max(tile, max_off), 128)            # halo fits in one tile
    Ppad = _round_up(D * HpWp, T)                     # tiled flat output length
    nT = Ppad // T
    Lpad = (nT + 1) * T                               # +1 tile for the halo view

    # ---- layout prep (XLA glue) -------------------------------------------
    # TODO(synk): jnp.pad materializes the haloed input in HBM (one extra
    # read+write of the input); folding the halo into the kernel would need
    # per-tap boundary masking.
    xp = jnp.pad(x_ncdhw, ((0, 0), (0, 0), (pad, pad), (pad, pad), (pad, pad)))
    xflat = xp.reshape(N, Cin, Dp * HpWp)
    xflat = jnp.pad(xflat, ((0, 0), (0, 0), (0, Lpad - Dp * HpWp)))

    # (Cout, Cin, K, K, K) -> (Cout, K^3*Cin); column order == im2col row order.
    kkkc = K * K * K * Cin
    w_mat = jnp.transpose(weight_oidhw, (0, 2, 3, 4, 1)).reshape(Cout, kkkc)

    if use_bf16:   # optional bf16 MXU path (f32 accumulation, f32 BN stats)
        xflat = xflat.astype(jnp.bfloat16)
        w_mat = w_mat.astype(jnp.bfloat16)

    # Validity mask of the flat index space (padded-stride junk columns and
    # tile round-up are excluded from the BN statistics).
    p = jnp.arange(Ppad, dtype=jnp.int32)
    valid = (p // HpWp < D) & ((p % HpWp) // Wp < H) & (p % Wp < W)
    mask = valid.astype(jnp.float32)[None, :]         # (1, Ppad)

    conv_flat, stats = pl.pallas_call(
        functools.partial(_conv3d_im2col_kernel, tap_offsets=tap_offsets),
        out_shape=(jax.ShapeDtypeStruct((N, Cout, Ppad), jnp.float32),
                   jax.ShapeDtypeStruct((N, nT, Cout, 2), jnp.float32)),
        grid=(N, nT),
        in_specs=[
            pl.BlockSpec((1, Cin, T), lambda n, t: (n, 0, t)),      # window lo
            pl.BlockSpec((1, Cin, T), lambda n, t: (n, 0, t + 1)),  # window hi (halo)
            pl.BlockSpec((Cout, kkkc), lambda n, t: (0, 0)),
            pl.BlockSpec((1, T), lambda n, t: (0, t)),
        ],
        out_specs=(
            pl.BlockSpec((1, Cout, T), lambda n, t: (n, 0, t)),
            pl.BlockSpec((1, 1, Cout, 2), lambda n, t: (n, t, 0, 0)),
        ),
        scratch_shapes=[
            pltpu.VMEM((Cin, 2 * T), xflat.dtype),    # staged halo window
            pltpu.VMEM((kkkc, T), xflat.dtype),       # im2col matrix
        ],
        compiler_params=pltpu.CompilerParams(
            dimension_semantics=("parallel", "parallel")),
    )(xflat, xflat, w_mat, mask)

    # ---- BatchNorm affine from fused statistics (O(Cout) XLA glue) ---------
    tot = jnp.sum(stats, axis=(0, 1))                 # (Cout, 2)
    count = float(N * D * H * W)
    mean = tot[:, 0] / count
    var = jnp.maximum(tot[:, 1] / count - mean * mean, 0.0)  # biased, as torch BN
    inv = gamma * jax.lax.rsqrt(var + eps)
    scale = inv.reshape(Cout, 1).astype(jnp.float32)
    shift = (beta - mean * inv).reshape(Cout, 1).astype(jnp.float32)
    # TODO(synk): running_mean/running_var buffer updates (training-mode side
    # effect) are not reproduced; they do not affect the forward output.

    out_flat = pl.pallas_call(
        _bn_relu_kernel,
        out_shape=jax.ShapeDtypeStruct((N, Cout, Ppad), jnp.float32),
        grid=(N, nT),
        in_specs=[
            pl.BlockSpec((1, Cout, T), lambda n, t: (n, 0, t)),
            pl.BlockSpec((Cout, 1), lambda n, t: (0, 0)),
            pl.BlockSpec((Cout, 1), lambda n, t: (0, 0)),
        ],
        out_specs=pl.BlockSpec((1, Cout, T), lambda n, t: (n, 0, t)),
        compiler_params=pltpu.CompilerParams(
            dimension_semantics=("parallel", "parallel")),
    )(conv_flat, scale, shift)

    # Crop the padded-stride junk columns; result is already NCDHW.
    out = out_flat[:, :, :D * HpWp].reshape(N, Cout, D, Hp, Wp)[:, :, :, :H, :W]
    return out


# ----------------------------------------------------------------------------
# Pure-JAX reference (NCDHW, same semantics as the PyTorch module in train mode)
# ----------------------------------------------------------------------------
def _reference(x, weight, gamma, beta, eps=1e-5):
    conv = jax.lax.conv_general_dilated(
        x, weight, window_strides=(1, 1, 1),
        padding=((1, 1), (1, 1), (1, 1)),
        dimension_numbers=("NCDHW", "OIDHW", "NCDHW"))
    mean = jnp.mean(conv, axis=(0, 2, 3, 4), keepdims=True)
    var = jnp.mean((conv - mean) ** 2, axis=(0, 2, 3, 4), keepdims=True)
    y = (conv - mean) * jax.lax.rsqrt(var + eps)
    y = y * gamma.reshape(1, -1, 1, 1, 1) + beta.reshape(1, -1, 1, 1, 1)
    return jnp.maximum(y, 0.0)


if __name__ == "__main__":
    key = jax.random.PRNGKey(0)
    kx, kw = jax.random.split(key)

    # Small shapes consistent with ConvBnReLU3D(in_channels=4, out_channels=8)
    N, Cin, Cout, D, H, W = 2, 4, 8, 6, 8, 8
    x = jax.random.normal(kx, (N, Cin, D, H, W), jnp.float32)
    conv_weight = jax.random.normal(kw, (Cout, Cin, 3, 3, 3), jnp.float32) * 0.1
    bn_gamma = jnp.ones((Cout,), jnp.float32)   # PyTorch BatchNorm3d default init
    bn_beta = jnp.zeros((Cout,), jnp.float32)

    out = jax.jit(conv_bn_relu_3d)(x, conv_weight, bn_gamma, bn_beta)
    out = jax.block_until_ready(out)

    ref = _reference(x, conv_weight, bn_gamma, bn_beta)
    assert out.shape == (N, Cout, D, H, W)
    err = float(jnp.max(jnp.abs(out - ref)))
    # Tolerance accommodates MXU reduced-precision accumulation passes; real
    # indexing/statistics bugs produce O(0.1 - 1) errors and would still trip.
    assert jnp.allclose(out, ref, atol=1e-2, rtol=1e-2), err

    print("KERNEL_OK")
</pallas_src>

<mosaic_0001>
module attributes {stable_mosaic.version = 11 : i64} {
  func.func @_conv3d_im2col_kernel(%arg0: i32, %arg1: i32, %arg2: memref<1x4x512xf32, #tpu.memory_space<vmem>>, %arg3: memref<1x4x512xf32, #tpu.memory_space<vmem>>, %arg4: memref<8x108xf32, #tpu.memory_space<vmem>>, %arg5: memref<1x512xf32, #tpu.memory_space<vmem>>, %arg6: memref<1x8x512xf32, #tpu.memory_space<vmem>>, %arg7: memref<1x1x8x2xf32, #tpu.memory_space<vmem>>, %arg8: memref<4x1024xf32, #tpu.memory_space<vmem>>, %arg9: memref<108x512xf32, #tpu.memory_space<vmem>>) attributes {dimension_semantics = [#tpu.dimension_semantics<parallel>, #tpu.dimension_semantics<parallel>], iteration_bounds = array<i64: 2, 2>, scalar_prefetch = 0 : i64, scratch_operands = 2 : i64, tpu.core_type = #tpu.core_type<tc>, window_params = [{transform_indices = @transform_0, window_bounds = array<i64: 1, 4, 512>}, {transform_indices = @transform_1, window_bounds = array<i64: 1, 4, 512>}, {pipeline_mode = #tpu.pipeline_mode<synchronous>, transform_indices = @transform_2, window_bounds = array<i64: 8, 108>}, {transform_indices = @transform_3, window_bounds = array<i64: 1, 512>}, {transform_indices = @transform_4, window_bounds = array<i64: 1, 8, 512>}, {transform_indices = @transform_5, window_bounds = array<i64: 1, 1, 8, 2>}]} {
    %c0 = arith.constant 0 : index
    %c0_0 = arith.constant 0 : index
    %c0_1 = arith.constant 0 : index
    %0 = vector.load %arg2[%c0, %c0_0, %c0_1] : memref<1x4x512xf32, #tpu.memory_space<vmem>>, vector<1x4x512xf32>
    %1 = vector.shape_cast %0 : vector<1x4x512xf32> to vector<4x512xf32>
    %c0_2 = arith.constant 0 : index
    %c0_3 = arith.constant 0 : index
    %2 = vector.load %arg8[%c0_2, %c0_3] : memref<4x1024xf32, #tpu.memory_space<vmem>>, vector<4x512xf32>
    tpu.vector_store %arg8[%c0_2, %c0_3], %1 {strides = array<i32>} : memref<4x1024xf32, #tpu.memory_space<vmem>>, vector<4x512xf32>,
    %c0_4 = arith.constant 0 : index
    %c0_5 = arith.constant 0 : index
    %c0_6 = arith.constant 0 : index
    %3 = vector.load %arg3[%c0_4, %c0_5, %c0_6] : memref<1x4x512xf32, #tpu.memory_space<vmem>>, vector<1x4x512xf32>
    %4 = vector.shape_cast %3 : vector<1x4x512xf32> to vector<4x512xf32>
    %c0_7 = arith.constant 0 : index
    %c512 = arith.constant 512 : index
    %5 = vector.load %arg8[%c0_7, %c512] : memref<4x1024xf32, #tpu.memory_space<vmem>>, vector<4x512xf32>
    tpu.vector_store %arg8[%c0_7, %c512], %4 {strides = array<i32>} : memref<4x1024xf32, #tpu.memory_space<vmem>>, vector<4x512xf32>,
    %c0_8 = arith.constant 0 : index
    %c0_9 = arith.constant 0 : index
    %6 = vector.load %arg8[%c0_8, %c0_9] : memref<4x1024xf32, #tpu.memory_space<vmem>>, vector<4x512xf32>
    %c0_10 = arith.constant 0 : index
    %c0_11 = arith.constant 0 : index
    %7 = vector.load %arg9[%c0_10, %c0_11] : memref<108x512xf32, #tpu.memory_space<vmem>>, vector<4x512xf32>
    tpu.vector_store %arg9[%c0_10, %c0_11], %6 {strides = array<i32>} : memref<108x512xf32, #tpu.memory_space<vmem>>, vector<4x512xf32>,
    %c0_12 = arith.constant 0 : index
    %c1 = arith.constant 1 : index
    %8 = vector.load %arg8[%c0_12, %c1] : memref<4x1024xf32, #tpu.memory_space<vmem>>, vector<4x512xf32>
    %c4 = arith.constant 4 : index
    %c0_13 = arith.constant 0 : index
    %9 = vector.load %arg9[%c4, %c0_13] : memref<108x512xf32, #tpu.memory_space<vmem>>, vector<4x512xf32>
    tpu.vector_store %arg9[%c4, %c0_13], %8 {strides = array<i32>} : memref<108x512xf32, #tpu.memory_space<vmem>>, vector<4x512xf32>,
    %c0_14 = arith.constant 0 : index
    %c2 = arith.constant 2 : index
    %10 = vector.load %arg8[%c0_14, %c2] : memref<4x1024xf32, #tpu.memory_space<vmem>>, vector<4x512xf32>
    %c8 = arith.constant 8 : index
    %c0_15 = arith.constant 0 : index
    %11 = vector.load %arg9[%c8, %c0_15] : memref<108x512xf32, #tpu.memory_space<vmem>>, vector<4x512xf32>
    tpu.vector_store %arg9[%c8, %c0_15], %10 {strides = array<i32>} : memref<108x512xf32, #tpu.memory_space<vmem>>, vector<4x512xf32>,
    %c0_16 = arith.constant 0 : index
    %c10 = arith.constant 10 : index
    %12 = vector.load %arg8[%c0_16, %c10] : memref<4x1024xf32, #tpu.memory_space<vmem>>, vector<4x512xf32>
    %c12 = arith.constant 12 : index
    %c0_17 = arith.constant 0 : index
    %13 = vector.load %arg9[%c12, %c0_17] : memref<108x512xf32, #tpu.memory_space<vmem>>, vector<4x512xf32>
    tpu.vector_store %arg9[%c12, %c0_17], %12 {strides = array<i32>} : memref<108x512xf32, #tpu.memory_space<vmem>>, vector<4x512xf32>,
    %c0_18 = arith.constant 0 : index
    %c11 = arith.constant 11 : index
    %14 = vector.load %arg8[%c0_18, %c11] : memref<4x1024xf32, #tpu.memory_space<vmem>>, vector<4x512xf32>
    %c16 = arith.constant 16 : index
    %c0_19 = arith.constant 0 : index
    %15 = vector.load %arg9[%c16, %c0_19] : memref<108x512xf32, #tpu.memory_space<vmem>>, vector<4x512xf32>
    tpu.vector_store %arg9[%c16, %c0_19], %14 {strides = array<i32>} : memref<108x512xf32, #tpu.memory_space<vmem>>, vector<4x512xf32>,
    %c0_20 = arith.constant 0 : index
    %c12_21 = arith.constant 12 : index
    %16 = vector.load %arg8[%c0_20, %c12_21] : memref<4x1024xf32, #tpu.memory_space<vmem>>, vector<4x512xf32>
    %c20 = arith.constant 20 : index
    %c0_22 = arith.constant 0 : index
    %17 = vector.load %arg9[%c20, %c0_22] : memref<108x512xf32, #tpu.memory_space<vmem>>, vector<4x512xf32>
    tpu.vector_store %arg9[%c20, %c0_22], %16 {strides = array<i32>} : memref<108x512xf32, #tpu.memory_space<vmem>>, vector<4x512xf32>,
    %c0_23 = arith.constant 0 : index
    %c20_24 = arith.constant 20 : index
    %18 = vector.load %arg8[%c0_23, %c20_24] : memref<4x1024xf32, #tpu.memory_space<vmem>>, vector<4x512xf32>
    %c24 = arith.constant 24 : index
    %c0_25 = arith.constant 0 : index
    %19 = vector.load %arg9[%c24, %c0_25] : memref<108x512xf32, #tpu.memory_space<vmem>>, vector<4x512xf32>
    tpu.vector_store %arg9[%c24, %c0_25], %18 {strides = array<i32>} : memref<108x512xf32, #tpu.memory_space<vmem>>, vector<4x512xf32>,
    %c0_26 = arith.constant 0 : index
    %c21 = arith.constant 21 : index
    %20 = vector.load %arg8[%c0_26, %c21] : memref<4x1024xf32, #tpu.memory_space<vmem>>, vector<4x512xf32>
    %c28 = arith.constant 28 : index
    %c0_27 = arith.constant 0 : index
    %21 = vector.load %arg9[%c28, %c0_27] : memref<108x512xf32, #tpu.memory_space<vmem>>, vector<4x512xf32>
    tpu.vector_store %arg9[%c28, %c0_27], %20 {strides = array<i32>} : memref<108x512xf32, #tpu.memory_space<vmem>>, vector<4x512xf32>,
    %c0_28 = arith.constant 0 : index
    %c22 = arith.constant 22 : index
    %22 = vector.load %arg8[%c0_28, %c22] : memref<4x1024xf32, #tpu.memory_space<vmem>>, vector<4x512xf32>
    %c32 = arith.constant 32 : index
    %c0_29 = arith.constant 0 : index
    %23 = vector.load %arg9[%c32, %c0_29] : memref<108x512xf32, #tpu.memory_space<vmem>>, vector<4x512xf32>
    tpu.vector_store %arg9[%c32, %c0_29], %22 {strides = array<i32>} : memref<108x512xf32, #tpu.memory_space<vmem>>, vector<4x512xf32>,
    %c0_30 = arith.constant 0 : index
    %c100 = arith.constant 100 : index
    %24 = vector.load %arg8[%c0_30, %c100] : memref<4x1024xf32, #tpu.memory_space<vmem>>, vector<4x512xf32>
    %c36 = arith.constant 36 : index
    %c0_31 = arith.constant 0 : index
    %25 = vector.load %arg9[%c36, %c0_31] : memref<108x512xf32, #tpu.memory_space<vmem>>, vector<4x512xf32>
    tpu.vector_store %arg9[%c36, %c0_31], %24 {strides = array<i32>} : memref<108x512xf32, #tpu.memory_space<vmem>>, vector<4x512xf32>,
    %c0_32 = arith.constant 0 : index
    %c101 = arith.constant 101 : index
    %26 = vector.load %arg8[%c0_32, %c101] : memref<4x1024xf32, #tpu.memory_space<vmem>>, vector<4x512xf32>
    %c40 = arith.constant 40 : index
    %c0_33 = arith.constant 0 : index
    %27 = vector.load %arg9[%c40, %c0_33] : memref<108x512xf32, #tpu.memory_space<vmem>>, vector<4x512xf32>
    tpu.vector_store %arg9[%c40, %c0_33], %26 {strides = array<i32>} : memref<108x512xf32, #tpu.memory_space<vmem>>, vector<4x512xf32>,
    %c0_34 = arith.constant 0 : index
    %c102 = arith.constant 102 : index
    %28 = vector.load %arg8[%c0_34, %c102] : memref<4x1024xf32, #tpu.memory_space<vmem>>, vector<4x512xf32>
    %c44 = arith.constant 44 : index
    %c0_35 = arith.constant 0 : index
    %29 = vector.load %arg9[%c44, %c0_35] : memref<108x512xf32, #tpu.memory_space<vmem>>, vector<4x512xf32>
    tpu.vector_store %arg9[%c44, %c0_35], %28 {strides = array<i32>} : memref<108x512xf32, #tpu.memory_space<vmem>>, vector<4x512xf32>,
    %c0_36 = arith.constant 0 : index
    %c110 = arith.constant 110 : index
    %30 = vector.load %arg8[%c0_36, %c110] : memref<4x1024xf32, #tpu.memory_space<vmem>>, vector<4x512xf32>
    %c48 = arith.constant 48 : index
    %c0_37 = arith.constant 0 : index
    %31 = vector.load %arg9[%c48, %c0_37] : memref<108x512xf32, #tpu.memory_space<vmem>>, vector<4x512xf32>
    tpu.vector_store %arg9[%c48, %c0_37], %30 {strides = array<i32>} : memref<108x512xf32, #tpu.memory_space<vmem>>, vector<4x512xf32>,
    %c0_38 = arith.constant 0 : index
    %c111 = arith.constant 111 : index
    %32 = vector.load %arg8[%c0_38, %c111] : memref<4x1024xf32, #tpu.memory_space<vmem>>, vector<4x512xf32>
    %c52 = arith.constant 52 : index
    %c0_39 = arith.constant 0 : index
    %33 = vector.load %arg9[%c52, %c0_39] : memref<108x512xf32, #tpu.memory_space<vmem>>, vector<4x512xf32>
    tpu.vector_store %arg9[%c52, %c0_39], %32 {strides = array<i32>} : memref<108x512xf32, #tpu.memory_space<vmem>>, vector<4x512xf32>,
    %c0_40 = arith.constant 0 : index
    %c112 = arith.constant 112 : index
    %34 = vector.load %arg8[%c0_40, %c112] : memref<4x1024xf32, #tpu.memory_space<vmem>>, vector<4x512xf32>
    %c56 = arith.constant 56 : index
    %c0_41 = arith.constant 0 : index
    %35 = vector.load %arg9[%c56, %c0_41] : memref<108x512xf32, #tpu.memory_space<vmem>>, vector<4x512xf32>
    tpu.vector_store %arg9[%c56, %c0_41], %34 {strides = array<i32>} : memref<108x512xf32, #tpu.memory_space<vmem>>, vector<4x512xf32>,
    %c0_42 = arith.constant 0 : index
    %c120 = arith.constant 120 : index
    %36 = vector.load %arg8[%c0_42, %c120] : memref<4x1024xf32, #tpu.memory_space<vmem>>, vector<4x512xf32>
    %c60 = arith.constant 60 : index
    %c0_43 = arith.constant 0 : index
    %37 = vector.load %arg9[%c60, %c0_43] : memref<108x512xf32, #tpu.memory_space<vmem>>, vector<4x512xf32>
    tpu.vector_store %arg9[%c60, %c0_43], %36 {strides = array<i32>} : memref<108x512xf32, #tpu.memory_space<vmem>>, vector<4x512xf32>,
    %c0_44 = arith.constant 0 : index
    %c121 = arith.constant 121 : index
    %38 = vector.load %arg8[%c0_44, %c121] : memref<4x1024xf32, #tpu.memory_space<vmem>>, vector<4x512xf32>
    %c64 = arith.constant 64 : index
    %c0_45 = arith.constant 0 : index
    %39 = vector.load %arg9[%c64, %c0_45] : memref<108x512xf32, #tpu.memory_space<vmem>>, vector<4x512xf32>
    tpu.vector_store %arg9[%c64, %c0_45], %38 {strides = array<i32>} : memref<108x512xf32, #tpu.memory_space<vmem>>, vector<4x512xf32>,
    %c0_46 = arith.constant 0 : index
    %c122 = arith.constant 122 : index
    %40 = vector.load %arg8[%c0_46, %c122] : memref<4x1024xf32, #tpu.memory_space<vmem>>, vector<4x512xf32>
    %c68 = arith.constant 68 : index
    %c0_47 = arith.constant 0 : index
    %41 = vector.load %arg9[%c68, %c0_47] : memref<108x512xf32, #tpu.memory_space<vmem>>, vector<4x512xf32>
    tpu.vector_store %arg9[%c68, %c0_47], %40 {strides = array<i32>} : memref<108x512xf32, #tpu.memory_space<vmem>>, vector<4x512xf32>,
    %c0_48 = arith.constant 0 : index
    %c200 = arith.constant 200 : index
    %42 = vector.load %arg8[%c0_48, %c200] : memref<4x1024xf32, #tpu.memory_space<vmem>>, vector<4x512xf32>
    %c72 = arith.constant 72 : index
    %c0_49 = arith.constant 0 : index
    %43 = vector.load %arg9[%c72, %c0_49] : memref<108x512xf32, #tpu.memory_space<vmem>>, vector<4x512xf32>
    tpu.vector_store %arg9[%c72, %c0_49], %42 {strides = array<i32>} : memref<108x512xf32, #tpu.memory_space<vmem>>, vector<4x512xf32>,
    %c0_50 = arith.constant 0 : index
    %c201 = arith.constant 201 : index
    %44 = vector.load %arg8[%c0_50, %c201] : memref<4x1024xf32, #tpu.memory_space<vmem>>, vector<4x512xf32>
    %c76 = arith.constant 76 : index
    %c0_51 = arith.constant 0 : index
    %45 = vector.load %arg9[%c76, %c0_51] : memref<108x512xf32, #tpu.memory_space<vmem>>, vector<4x512xf32>
    tpu.vector_store %arg9[%c76, %c0_51], %44 {strides = array<i32>} : memref<108x512xf32, #tpu.memory_space<vmem>>, vector<4x512xf32>,
    %c0_52 = arith.constant 0 : index
    %c202 = arith.constant 202 : index
    %46 = vector.load %arg8[%c0_52, %c202] : memref<4x1024xf32, #tpu.memory_space<vmem>>, vector<4x512xf32>
    %c80 = arith.constant 80 : index
    %c0_53 = arith.constant 0 : index
    %47 = vector.load %arg9[%c80, %c0_53] : memref<108x512xf32, #tpu.memory_space<vmem>>, vector<4x512xf32>
    tpu.vector_store %arg9[%c80, %c0_53], %46 {strides = array<i32>} : memref<108x512xf32, #tpu.memory_space<vmem>>, vector<4x512xf32>,
    %c0_54 = arith.constant 0 : index
    %c210 = arith.constant 210 : index
    %48 = vector.load %arg8[%c0_54, %c210] : memref<4x1024xf32, #tpu.memory_space<vmem>>, vector<4x512xf32>
    %c84 = arith.constant 84 : index
    %c0_55 = arith.constant 0 : index
    %49 = vector.load %arg9[%c84, %c0_55] : memref<108x512xf32, #tpu.memory_space<vmem>>, vector<4x512xf32>
    tpu.vector_store %arg9[%c84, %c0_55], %48 {strides = array<i32>} : memref<108x512xf32, #tpu.memory_space<vmem>>, vector<4x512xf32>,
    %c0_56 = arith.constant 0 : index
    %c211 = arith.constant 211 : index
    %50 = vector.load %arg8[%c0_56, %c211] : memref<4x1024xf32, #tpu.memory_space<vmem>>, vector<4x512xf32>
    %c88 = arith.constant 88 : index
    %c0_57 = arith.constant 0 : index
    %51 = vector.load %arg9[%c88, %c0_57] : memref<108x512xf32, #tpu.memory_space<vmem>>, vector<4x512xf32>
    tpu.vector_store %arg9[%c88, %c0_57], %50 {strides = array<i32>} : memref<108x512xf32, #tpu.memory_space<vmem>>, vector<4x512xf32>,
    %c0_58 = arith.constant 0 : index
    %c212 = arith.constant 212 : index
    %52 = vector.load %arg8[%c0_58, %c212] : memref<4x1024xf32, #tpu.memory_space<vmem>>, vector<4x512xf32>
    %c92 = arith.constant 92 : index
    %c0_59 = arith.constant 0 : index
    %53 = vector.load %arg9[%c92, %c0_59] : memref<108x512xf32, #tpu.memory_space<vmem>>, vector<4x512xf32>
    tpu.vector_store %arg9[%c92, %c0_59], %52 {strides = array<i32>} : memref<108x512xf32, #tpu.memory_space<vmem>>, vector<4x512xf32>,
    %c0_60 = arith.constant 0 : index
    %c220 = arith.constant 220 : index
    %54 = vector.load %arg8[%c0_60, %c220] : memref<4x1024xf32, #tpu.memory_space<vmem>>, vector<4x512xf32>
    %c96 = arith.constant 96 : index
    %c0_61 = arith.constant 0 : index
    %55 = vector.load %arg9[%c96, %c0_61] : memref<108x512xf32, #tpu.memory_space<vmem>>, vector<4x512xf32>
    tpu.vector_store %arg9[%c96, %c0_61], %54 {strides = array<i32>} : memref<108x512xf32, #tpu.memory_space<vmem>>, vector<4x512xf32>,
    %c0_62 = arith.constant 0 : index
    %c221 = arith.constant 221 : index
    %56 = vector.load %arg8[%c0_62, %c221] : memref<4x1024xf32, #tpu.memory_space<vmem>>, vector<4x512xf32>
    %c100_63 = arith.constant 100 : index
    %c0_64 = arith.constant 0 : index
    %57 = vector.load %arg9[%c100_63, %c0_64] : memref<108x512xf32, #tpu.memory_space<vmem>>, vector<4x512xf32>
    tpu.vector_store %arg9[%c100_63, %c0_64], %56 {strides = array<i32>} : memref<108x512xf32, #tpu.memory_space<vmem>>, vector<4x512xf32>,
    %c0_65 = arith.constant 0 : index
    %c222 = arith.constant 222 : index
    %58 = vector.load %arg8[%c0_65, %c222] : memref<4x1024xf32, #tpu.memory_space<vmem>>, vector<4x512xf32>
    %c104 = arith.constant 104 : index
    %c0_66 = arith.constant 0 : index
    %59 = vector.load %arg9[%c104, %c0_66] : memref<108x512xf32, #tpu.memory_space<vmem>>, vector<4x512xf32>
    tpu.vector_store %arg9[%c104, %c0_66], %58 {strides = array<i32>} : memref<108x512xf32, #tpu.memory_space<vmem>>, vector<4x512xf32>,
    %c0_67 = arith.constant 0 : index
    %c0_68 = arith.constant 0 : index
    %60 = vector.load %arg4[%c0_67, %c0_68] : memref<8x108xf32, #tpu.memory_space<vmem>>, vector<8x108xf32>
    %c0_69 = arith.constant 0 : index
    %c0_70 = arith.constant 0 : index
    %61 = vector.load %arg9[%c0_69, %c0_70] : memref<108x512xf32, #tpu.memory_space<vmem>>, vector<108x512xf32>
    %cst = arith.constant dense<0.000000e+00> : vector<8x512xf32>
    %62 = tpu.matmul %60, %61, %cst {dimension_numbers = #tpu.dot_dimension_numbers<[1], [0], [0], [1], [0, 0, 1, 1], [], []>} : vector<8x108xf32>, vector<108x512xf32>, vector<8x512xf32> -> vector<8x512xf32>
    %c0_71 = arith.constant 0 : index
    %c0_72 = arith.constant 0 : index
    %c0_73 = arith.constant 0 : index
    %63 = vector.load %arg6[%c0_71, %c0_72, %c0_73] : memref<1x8x512xf32, #tpu.memory_space<vmem>>, vector<1x8x512xf32>
    %64 = vector.shape_cast %63 : vector<1x8x512xf32> to vector<8x512xf32>
    %65 = vector.shape_cast %62 : vector<8x512xf32> to vector<1x8x512xf32>
    tpu.vector_store %arg6[%c0_71, %c0_72, %c0_73], %65 {strides = array<i32>} : memref<1x8x512xf32, #tpu.memory_space<vmem>>, vector<1x8x512xf32>,
    %c0_74 = arith.constant 0 : index
    %c0_75 = arith.constant 0 : index
    %66 = vector.load %arg5[%c0_74, %c0_75] : memref<1x512xf32, #tpu.memory_space<vmem>>, vector<1x512xf32>
    %67 = vector.broadcast %66 : vector<1x512xf32> to vector<8x512xf32>
    %68 = arith.mulf %62, %67 : vector<8x512xf32>
    %cst_76 = arith.constant dense<0.000000e+00> : vector<8xf32>
    %69 = vector.multi_reduction <add>, %68, %cst_76 [1] : vector<8x512xf32> to vector<8xf32>
    %70 = vector.shape_cast %69 : vector<8xf32> to vector<8x1xf32>
    %71 = arith.mulf %68, %62 : vector<8x512xf32>
    %cst_77 = arith.constant dense<0.000000e+00> : vector<8xf32>
    %72 = vector.multi_reduction <add>, %71, %cst_77 [1] : vector<8x512xf32> to vector<8xf32>
    %73 = vector.shape_cast %72 : vector<8xf32> to vector<8x1xf32>
    %74 = tpu.concatenate %70, %73 in 1 : vector<8x1xf32>, vector<8x1xf32> -> vector<8x2xf32>
    %c0_78 = arith.constant 0 : index
    %c0_79 = arith.constant 0 : index
    %c0_80 = arith.constant 0 : index
    %c0_81 = arith.constant 0 : index
    %75 = vector.load %arg7[%c0_78, %c0_79, %c0_80, %c0_81] : memref<1x1x8x2xf32, #tpu.memory_space<vmem>>, vector<1x1x8x2xf32>
    %76 = vector.shape_cast %75 : vector<1x1x8x2xf32> to vector<8x2xf32>
    %77 = vector.shape_cast %74 : vector<8x2xf32> to vector<1x1x8x2xf32>
    tpu.vector_store %arg7[%c0_78, %c0_79, %c0_80, %c0_81], %77 {strides = array<i32>} : memref<1x1x8x2xf32, #tpu.memory_space<vmem>>, vector<1x1x8x2xf32>,
    return
  }
  func.func @transform_0(%arg0: i32, %arg1: i32) -> (i32, i32, i32) {
    %c0_i32 = arith.constant 0 : i32
    %c0_i32_0 = arith.constant 0 : i32
    return %arg0, %c0_i32, %arg1 : i32, i32, i32
  }
  func.func @transform_1(%arg0: i32, %arg1: i32) -> (i32, i32, i32) {
    %c1_i32 = arith.constant 1 : i32
    %0 = arith.addi %arg1, %c1_i32 : i32
    %c0_i32 = arith.constant 0 : i32
    %c0_i32_0 = arith.constant 0 : i32
    return %arg0, %c0_i32, %0 : i32, i32, i32
  }
  func.func @transform_2(%arg0: i32, %arg1: i32) -> (i32, i32) {
    %c0_i32 = arith.constant 0 : i32
    %c0_i32_0 = arith.constant 0 : i32
    %c0_i32_1 = arith.constant 0 : i32
    return %c0_i32, %c0_i32_0 : i32, i32
  }
  func.func @transform_3(%arg0: i32, %arg1: i32) -> (i32, i32) {
    %c0_i32 = arith.constant 0 : i32
    %c0_i32_0 = arith.constant 0 : i32
    return %c0_i32, %arg1 : i32, i32
  }
  func.func @transform_4(%arg0: i32, %arg1: i32) -> (i32, i32, i32) {
    %c0_i32 = arith.constant 0 : i32
    %c0_i32_0 = arith.constant 0 : i32
    return %arg0, %c0_i32, %arg1 : i32, i32, i32
  }
  func.func @transform_5(%arg0: i32, %arg1: i32) -> (i32, i32, i32, i32) {
    %c0_i32 = arith.constant 0 : i32
    %c0_i32_0 = arith.constant 0 : i32
    %c0_i32_1 = arith.constant 0 : i32
    return %arg0, %arg1, %c0_i32, %c0_i32_0 : i32, i32, i32, i32
  }
}

module attributes {stable_mosaic.version = 11 : i64} {
  func.func @_bn_relu_kernel(%arg0: i32, %arg1: i32, %arg2: memref<1x8x512xf32, #tpu.memory_space<vmem>>, %arg3: memref<8x1xf32, #tpu.memory_space<vmem>>, %arg4: memref<8x1xf32, #tpu.memory_space<vmem>>, %arg5: memref<1x8x512xf32, #tpu.memory_space<vmem>>) attributes {dimension_semantics = [#tpu.dimension_semantics<parallel>, #tpu.dimension_semantics<parallel>], iteration_bounds = array<i64: 2, 2>, scalar_prefetch = 0 : i64, scratch_operands = 0 : i64, tpu.core_type = #tpu.core_type<tc>, window_params = [{transform_indices = @transform_0, window_bounds = array<i64: 1, 8, 512>}, {pipeline_mode = #tpu.pipeline_mode<synchronous>, transform_indices = @transform_1, window_bounds = array<i64: 8, 1>}, {pipeline_mode = #tpu.pipeline_mode<synchronous>, transform_indices = @transform_2, window_bounds = array<i64: 8, 1>}, {transform_indices = @transform_3, window_bounds = array<i64: 1, 8, 512>}]} {
    %c0 = arith.constant 0 : index
    %c0_0 = arith.constant 0 : index
    %c0_1 = arith.constant 0 : index
    %0 = vector.load %arg2[%c0, %c0_0, %c0_1] : memref<1x8x512xf32, #tpu.memory_space<vmem>>, vector<1x8x512xf32>
    %1 = vector.shape_cast %0 : vector<1x8x512xf32> to vector<8x512xf32>
    %c0_2 = arith.constant 0 : index
    %c0_3 = arith.constant 0 : index
    %2 = vector.load %arg3[%c0_2, %c0_3] : memref<8x1xf32, #tpu.memory_space<vmem>>, vector<8x1xf32>
    %3 = vector.broadcast %2 : vector<8x1xf32> to vector<8x512xf32>
    %4 = arith.mulf %1, %3 : vector<8x512xf32>
    %c0_4 = arith.constant 0 : index
    %c0_5 = arith.constant 0 : index
    %5 = vector.load %arg4[%c0_4, %c0_5] : memref<8x1xf32, #tpu.memory_space<vmem>>, vector<8x1xf32>
    %6 = vector.broadcast %5 : vector<8x1xf32> to vector<8x512xf32>
    %7 = arith.addf %4, %6 : vector<8x512xf32>
    %cst = arith.constant 0.000000e+00 : f32
    %8 = vector.broadcast %cst : f32 to vector<8x512xf32>
    %9 = arith.maximumf %7, %8 : vector<8x512xf32>
    %c0_6 = arith.constant 0 : index
    %c0_7 = arith.constant 0 : index
    %c0_8 = arith.constant 0 : index
    %10 = vector.load %arg5[%c0_6, %c0_7, %c0_8] : memref<1x8x512xf32, #tpu.memory_space<vmem>>, vector<1x8x512xf32>
    %11 = vector.shape_cast %10 : vector<1x8x512xf32> to vector<8x512xf32>
    %12 = vector.shape_cast %9 : vector<8x512xf32> to vector<1x8x512xf32>
    tpu.vector_store %arg5[%c0_6, %c0_7, %c0_8], %12 {strides = array<i32>} : memref<1x8x512xf32, #tpu.memory_space<vmem>>, vector<1x8x512xf32>,
    return
  }
  func.func @transform_0(%arg0: i32, %arg1: i32) -> (i32, i32, i32) {
    %c0_i32 = arith.constant 0 : i32
    %c0_i32_0 = arith.constant 0 : i32
    return %arg0, %c0_i32, %arg1 : i32, i32, i32
  }
  func.func @transform_1(%arg0: i32, %arg1: i32) -> (i32, i32) {
    %c0_i32 = arith.constant 0 : i32
    %c0_i32_0 = arith.constant 0 : i32
    %c0_i32_1 = arith.constant 0 : i32
    return %c0_i32, %c0_i32_0 : i32, i32
  }
  func.func @transform_2(%arg0: i32, %arg1: i32) -> (i32, i32) {
    %c0_i32 = arith.constant 0 : i32
    %c0_i32_0 = arith.constant 0 : i32
    %c0_i32_1 = arith.constant 0 : i32
    return %c0_i32, %c0_i32_0 : i32, i32
  }
  func.func @transform_3(%arg0: i32, %arg1: i32) -> (i32, i32, i32) {
    %c0_i32 = arith.constant 0 : i32
    %c0_i32_0 = arith.constant 0 : i32
    return %arg0, %c0_i32, %arg1 : i32, i32, i32
  }
}

</mosaic_0001>

<bundles_post_ra>
// kernel: conv_bn_relu_3d.3
= control target key start
LH: loop header
LB: loop body
LE: loop exit
PB: predicated region body
PF: predicated region fallthrough
CT: control target
= control target key end

     0   :  { %s448_s12 = smov 0   ;;  %s450_s13 = smov 0   ;;  %s505_s0 = inlined_call_operand.vmem [shape: f32[2,8,1024], index: 0, kind: input, shape index: {}]   ;;  %s506_s1 = inlined_call_operand.vmem [shape: f32[8,1], index: 1, kind: input, shape index: {}]   ;;  %s507_s2 = inlined_call_operand.vmem [shape: f32[8,1], index: 2, kind: input, shape index: {}]   ;;  %s508_s3 = inlined_call_operand.vmem [shape: f32[2,8,1024], index: 3, kind: output, shape index: {}]  }
   0x1   :  { %s452_s14 = smov 0   ;;  %s454_s15 = smov 0  }
   0x2   :  { %s456_s16 = smov 0  }
   0x3 LB: > { %s22_s17 = sadd.s32 1, %s417_s14  ;;  %s25_s18 = sadd.s32 1, %s421_s15  ;;  %s425_s16 = sphi %s456_s16, %s13_s16   ;;  %s421_s15 = sphi %s454_s15, %s512_s15   ;;  %s417_s14 = sphi %s452_s14, %s511_s14   ;;  %s413_s13 = sphi %s450_s13, %s510_s13   ;;  %s409_s12 = sphi %s448_s12, %s509_s12  }
   0x4   : > { %p23_p0 = scmp.ge.s32.totalorder %s22_s17, 2  ;;  %p336_p1 = scmp.ge.s32.totalorder %s425_s16, 1 }
   0x5   : > { %p158_p2 = scmp.lt.s32.totalorder %s425_s16, 5 }
   0x6   : > { %s514_s17 = smov (%p23_p0, %s22_s17), 0  ;;  %s516_s18 = smov (!%p23_p0, %s25_s18), %s421_s15 }
   0x7   : > { %p159_p3 = pnand %p336_p1, %p158_p2  ;;  %p27_p4 = scmp.ge.s32.totalorder %s516_s18, 2 }
   0x8   : > { %s337_s23 = sshll.u32 (!%p159_p3), %s409_s12, 2  ;;  %p191_p5 = scmp.lt.s32.totalorder (!%p159_p3), %s413_s13, 1 }
   0x9   : > { %s518_s18 = smov (%p27_p4, %s516_s18), 0  ;;  %162 = sbr.rel (%p159_p3) target bundleno = 150 (0x96), region = 32 }
   0xa   : > { %p193_p6 = scmp.lt.s32.totalorder (!%p159_p3), %s337_s23, 7 }
   0xe   : > { %v214_v0 = vld [vmem:[%s506_s1] sm:$0xff]  ;;  %v427_v1 = vmov 0   ;;  %s520_s13 = smov (!%p191_p5, %s413_s13), 1  ;;  %s522_s23 = smov (!%p193_p6, %s337_s23), 7 }
   0xf   : > { %386 = vset.pattern.permute.xlu0 %v427_v1  ;;  %v224_v2 = vld [vmem:[%s507_s2] sm:$0xff]  ;;  %s338_s24 = sshll.u32 %s520_s13, 3 }
  0x10   : > { %217 = vperm.xlu0 %386, %v214_v0   ;;  %s196_s25 = sadd.s32 %s338_s24, %s522_s23 }
  0x11   : > { %s339_s26 = sshll.u32 %s196_s25, 3 }
  0x12   : > { %s198_s29 = scalar_lea.vmem %s505_s0, %s339_s26  ;;  %s208_s5 = scalar_lea.vmem %s508_s3, %s339_s26 }
  0x13   : > { %v210_v3 = vld [vmem:[%s198_s29] sm:$0xff]  ;;  %v211_v5 = vld [vmem:[%s198_s29 + $0x8] sm:$0xff]  ;;  %v212_v6 = vld [vmem:[%s198_s29 + $0x10] sm:$0xff] }
  0x14   : > { %227 = vperm.xlu0 %386, %v224_v2   ;;  %v213_v7 = vld [vmem:[%s198_s29 + $0x18] sm:$0xff] }
  0x8b   : > { %v218_v4 = vpop.permute.xlu0 %217 }
  0x8c   : > { %v220_v8 = vmul.f32 %v218_v4, %v210_v3  ;;  %v221_v9 = vmul.f32 %v218_v4, %v211_v5  ;;  %v222_v10 = vmul.f32 %v218_v4, %v212_v6  ;;  %v223_v11 = vmul.f32 %v218_v4, %v213_v7 }
  0x8f   : > { %v228_v12 = vpop.permute.xlu0 %227 }
  0x90   : > { %v230_v13 = vadd.f32 %v228_v12, %v220_v8  ;;  %v231_v14 = vadd.f32 %v228_v12, %v221_v9  ;;  %v232_v15 = vadd.f32 %v228_v12, %v222_v10  ;;  %v233_v16 = vadd.f32 %v228_v12, %v223_v11 }
  0x92   : > { %v234_v17 = vmax.f32 %v230_v13, 0.0  ;;  %v235_v18 = vmax.f32 %v231_v14, 0.0  ;;  %v236_v19 = vmax.f32 %v232_v15, 0.0  ;;  %v237_v20 = vmax.f32 %v233_v16, 0.0 }
  0x94   : > { %238 = vst [vmem:[%s208_s5] sm:$0xff] %v234_v17  ;;  %239 = vst [vmem:[%s208_s5 + $0x8] sm:$0xff] %v235_v18 }
  0x95   : > { %240 = vst [vmem:[%s208_s5 + $0x10] sm:$0xff] %v236_v19  ;;  %241 = vst [vmem:[%s208_s5 + $0x18] sm:$0xff] %v237_v20 }
  0x96 PF: > { %s13_s16 = sadd.s32 1, %s425_s16   ;;  %s509_s12 = smov %s417_s14 }
  0x97   : > { %p10_p7 = scmp.ge.s32.totalorder %s13_s16, 6   ;;  %s510_s13 = smov %s421_s15 }
  0x98   : > { %s511_s14 = smov %s514_s17  ;;  %s512_s15 = smov %s518_s18 }
  0x99   :  { %12 = sbr.rel (!%p10_p7) target bundleno = 3 (0x3), region = 62 }

// kernel: conv_bn_relu_3d.2
= control target key start
LH: loop header
LB: loop body
LE: loop exit
PB: predicated region body
PF: predicated region fallthrough
CT: control target
= control target key end

     0   :  { %s1826_s18 = smov 0   ;;  %s1828_s19 = smov 0   ;;  %s2342_s0 = inlined_call_operand.vmem [shape: f32[2,4,1536], index: 0, kind: input, shape index: {}, may-alias: {0,1}]   ;;  %s2343_s1 = inlined_call_operand.vmem [shape: f32[2,4,1536], index: 1, kind: input, shape index: {}, may-alias: {0,1}]   ;;  %s2344_s2 = inlined_call_operand.vmem [shape: f32[8,108], index: 2, kind: input, shape index: {}]   ;;  %s2345_s3 = inlined_call_operand.vmem [shape: f32[1,1024], index: 3, kind: input, shape index: {}]   ;;  %s2346_s4 = inlined_call_operand.vmem [shape: f32[2,8,1024], index: 4, kind: output, shape index: {0}]   ;;  %s2347_s5 = inlined_call_operand.vmem [shape: f32[2,2,8,2], index: 5, kind: output, shape index: {1}]  }
   0x1   :  { %s1830_s20 = smov 0   ;;  %s1832_s21 = smov 0  }
   0x2   :  { %s1834_s22 = smov 0  }
   0x3 LB: > { %s25_s23 = sadd.s32 1, %s1759_s20  ;;  %s28_s24 = sadd.s32 1, %s1763_s21  ;;  %s1767_s22 = sphi %s1834_s22, %s16_s22   ;;  %s1763_s21 = sphi %s1832_s21, %s2351_s21   ;;  %s1759_s20 = sphi %s1830_s20, %s2350_s20   ;;  %s1755_s19 = sphi %s1828_s19, %s2349_s19   ;;  %s1751_s18 = sphi %s1826_s18, %s2348_s18  }
   0x4   : > { %p26_p0 = scmp.ge.s32.totalorder %s25_s23, 2  ;;  %p1617_p1 = scmp.ge.s32.totalorder %s1767_s22, 1 }
   0x5   : > { %p244_p2 = scmp.lt.s32.totalorder %s1767_s22, 5 }
   0x6   : > { %s2353_s23 = smov (%p26_p0, %s25_s23), 0  ;;  %s2355_s24 = smov (!%p26_p0, %s28_s24), %s1763_s21 }
   0x7   : > { %p245_p3 = pnand %p1617_p1, %p244_p2  ;;  %p30_p4 = scmp.ge.s32.totalorder %s2355_s24, 2 }
   0x8   : > { %s1859_s25 = sshll.u32 (!%p245_p3), %s1751_s18, 2  ;;  %p303_p5 = scmp.lt.s32.totalorder (!%p245_p3), %s1755_s19, 1 }
   0x9   : > { %s2357_s24 = smov (%p30_p4, %s2355_s24), 0  ;;  %248 = sbr.rel (%p245_p3) target bundleno = 754 (0x2f2), region = 36 }
   0xa   : > { %p305_p6 = scmp.lt.s32.totalorder (!%p245_p3), %s1859_s25, 11  ;;  %s1637_s26 = sadd.s32 (!%p245_p3), 4, %s1859_s25 }
   0xb   : > { %p316_p7 = scmp.lt.s32.totalorder (!%p245_p3), %s1637_s26, 11  ;;  %s1769_s14 = smov (!%p245_p3), 34  }
   0xc   : > { %s1770_s15 = smov (!%p245_p3), 35   ;;  %s1771_s16 = smov (!%p245_p3), 36  }
   0xd   : > { %s1772_s17 = smov (!%p245_p3), 44   ;;  %s1778_s6 = smov (!%p245_p3), 7  }
   0xe   : > { %s2359_s19 = smov (!%p303_p5, %s1755_s19), 1  ;;  %s2361_s26 = smov (!%p316_p7, %s1637_s26), 11  ;;  %vm1110_vm0 = vcmask 293888   ;;  %vm1173_vm1 = vcmask 277504   ;;  %vm1047_vm2 = vcmask 367616   ;;  %vm1142_vm3 = vcmask 285696  }
   0xf   : > { %s306_s27 = scalar_select %p305_p6, %s1859_s25, 11  ;;  %vm1246_vm4 = vcmask 1043456   ;;  %vm1079_vm5 = vcmask 359424   ;;  %vm984_vm6 = vcmask 441344   ;;  %vm1016_vm7 = vcmask 375808  }
  0x10   : > { %s1638_s28 = smul.u32 12, %s2359_s19  ;;  %s1779_s7 = smov 6   ;;  %vm921_vm8 = vcmask 457728   ;;  %vm953_vm9 = vcmask 449536   ;;  %vm858_vm10 = vcmask 56320   ;;  %vm890_vm11 = vcmask 48128  }
  0x11   : > { %s1783_s11 = smov 17   ;;  %s1784_s12 = smov 27   ;;  %vm795_vm12 = vcmask 130048   ;;  %vm827_vm13 = vcmask 64512   ;;  %vm732_vm14 = vcmask 146432   ;;  %vm764_vm15 = vcmask 138240  }
  0x12   : > { %s308_s29 = sadd.s32 %s1638_s28, %s306_s27  ;;  %s319_s9 = sadd.s32 %s1638_s28, %s2361_s26 }
  0x13   : > { %s1619_s30 = sshll.u32 %s308_s29, 2  ;;  %s1621_s10 = sshll.u32 %s319_s9, 2 }
  0x14   : > { %s310_s8 = scalar_lea.vmem %s2342_s0, %s1619_s30  ;;  %s321_s13 = scalar_lea.vmem %s2343_s1, %s1621_s10 }
  0x15   : > { %v1870_v0 = vld [vmem:[%s310_s8 + $0x8] sm:$0xff]  ;;  %v1872_v1 = vld [vmem:[%s310_s8] sm:$0xff]  ;;  %s1773_s26 = smov 45   ;;  %s1774_s27 = smov 54  }
  0x16   : > { %350 = vst [vmem:[#allocation2 + $0x8] sm:$0xff] %v1870_v0  ;;  %349 = vst [vmem:[#allocation2] sm:$0xff] %v1872_v1  ;;  %v351_v2 = vld [vmem:[%s321_s13] sm:$0xff]  ;;  %s1775_s28 = smov 46   ;;  %s1776_s29 = smov 56   ;;  %v1923_v13 = vcombine.high %v1872_v1, %v1872_v1  ;;  %v1937_v15 = vcombine.low %v1870_v0, %v1870_v0  ;;  %v1950_v18 = vcombine.low %v1872_v1, %v1872_v1 }
  0x17   : > { %353 = vst [vmem:[#allocation2 + $0x10] sm:$0xff] %v351_v2  ;;  %s1777_s30 = smov 55   ;;  %s1780_s8 = smov 16   ;;  %v1972_v22 = vcombine.high %v1870_v0, %v1870_v0 }
  0x18   : > { %s1781_s9 = smov 8   ;;  %s1782_s10 = smov 18  }
  0x19   : > { %s1785_s13 = smov 26   ;;  %p325_p8 = scmp.lt.s32.totalorder %s1859_s25, 7 }
  0x1a   : > { %p341_p9 = scmp.lt.s32.totalorder %s1751_s18, 1 }
  0x1b   : > { %s2363_s25 = smov (!%p325_p8, %s1859_s25), 7 }
  0x1c   : > { %s2365_s18 = smov (!%p341_p9, %s1751_s18), 1 }
  0x1d   : > { %v1155_v3 = vld [vmem:[#allocation2 + $0x4] sm:$0xff] }
  0x1e   : > { %1163 = vrot.lane.b32.xlu1 %v1155_v3, %s1769_s14  ;;  %v1879_v4 = vld [vmem:[#allocation2 + $0xc] sm:$0xff]  ;;  %v1161_v5 = vcombine.high %v1155_v3, %v1155_v3  ;;  %v1129_v8 = vcombine.low %v1155_v3, %v1155_v3  ;;  %v1157_v9 = vld [vmem:[#allocation2 + $0x14] sm:$0xf] }
  0x1f   : > { %1167 = vrot.lane.b32.xlu0 %v1879_v4, %s1769_s14  ;;  %v1130_v6 = vcombine.low %v1879_v4, %v1879_v4  ;;  %v1162_v7 = vcombine.high %v1879_v4, %v1879_v4  ;;  %v1094_v10 = vld [vmem:[#allocation2 + $0x14] sm:$0xf]  ;;  %v842_v27 = vld [vmem:[#allocation2 + $0x10] sm:$0xf] }
  0x20   : > { %v1710_v11 = vld [vmem:[#allocation2 + $0x14] ss:$0 sps:$4 sm:$0xff]   ;;  %v1718_v30 = vld [vmem:[#allocation2 + $0x10] ss:$0 sps:$4 sm:$0xff]  }
  0x21   : > { %v1031_v12 = vld [vmem:[#allocation2 + $0x14] sm:$0xf]  ;;  %v779_v52 = vld [vmem:[#allocation2 + $0x10] sm:$0xf] }
  0x22   : > { %1134 = vrot.lane.b32.xlu1 %v1155_v3, %s1770_s15  ;;  %v1711_v14 = vld [vmem:[#allocation2 + $0x14] ss:$0 sps:$4 sm:$0xff]   ;;  %v1719_v57 = vld [vmem:[#allocation2 + $0x10] ss:$0 sps:$4 sm:$0xff]  }
  0x23   : > { %1104 = vrot.lane.b32.xlu0 %v1879_v4, %s1771_s16  ;;  %v968_v16 = vld [vmem:[#allocation2 + $0x14] sm:$0xf] }
  0x24   : > { %v1716_v17 = vld [vmem:[#allocation2 + $0x14] ss:$0 sps:$4 sm:$0xff]  }
  0x25   : > { %v905_v19 = vld [vmem:[#allocation2 + $0x14] sm:$0xf] }
  0x26   : > { %1100 = vrot.lane.b32.xlu1 %v1155_v3, %s1771_s16  ;;  %v1717_v20 = vld [vmem:[#allocation2 + $0x14] ss:$0 sps:$4 sm:$0xff]  }
  0x27   : > { %1041 = vrot.lane.b32.xlu0 %v1879_v4, %s1773_s26 }
  0x2a   : > { %1071 = vrot.lane.b32.xlu1 %v1155_v3, %s1772_s17 }
  0x2b   : > { %1165 = vrot.lane.b32.xlu0 %v1161_v5, %s1769_s14 }
  0x2e   : > { %1102 = vrot.lane.b32.xlu1 %v1161_v5, %s1771_s16 }
  0x2f   : > { %1136 = vrot.lane.b32.xlu0 %v1130_v6, %s1770_s15 }
  0x32   : > { %1039 = vrot.lane.b32.xlu1 %v1161_v5, %s1773_s26 }
  0x33   : > { %1132 = vrot.lane.b32.xlu0 %v1129_v8, %s1770_s15 }
  0x36   : > { %1169 = vrot.lane.b32.xlu1 %v1162_v7, %s1769_s14 }
  0x37   : > { %1073 = vrot.lane.b32.xlu0 %v1130_v6, %s1772_s17 }
  0x3a   : > { %1037 = vrot.lane.b32.xlu1 %v1155_v3, %s1773_s26 }
  0x3b   : > { %1171 = vrot.lane.b32.xlu0 %v1157_v9, %s1769_s14  ;;  %s1786_s14 = smov 106  }
  0x3e   : > { %976 = vrot.lane.b32.xlu1 %v1161_v5, %s1774_s27 }
  0x3f   : > { %1069 = vrot.lane.b32.xlu0 %v1129_v8, %s1772_s17 }
  0x42   : > { %1008 = vrot.lane.b32.xlu1 %v1155_v3, %s1775_s28 }
  0x43   : > { %978 = vrot.lane.b32.xlu0 %v1879_v4, %s1774_s27 }
  0x46   : > { %1106 = vrot.lane.b32.xlu1 %v1162_v7, %s1771_s16 }
  0x47   : > { %1010 = vrot.lane.b32.xlu0 %v1130_v6, %s1775_s28 }
  0x4a   : > { %1138 = vrot.lane.b32.xlu1 %v1879_v4, %s1770_s15 }
  0x4b   : > { %1108 = vrot.lane.b32.xlu0 %v1094_v10, %s1771_s16  ;;  %s1788_s16 = smov 108  }
  0x4e   : > { %974 = vrot.lane.b32.xlu1 %v1155_v3, %s1774_s27 }
  0x4f   : > { %1140 = vrot.lane.b32.xlu0 %v1710_v11, %s1770_s15  ;;  %s1787_s15 = smov 28  }
  0x52   : > { %913 = vrot.lane.b32.xlu1 %v1161_v5, %s1776_s29 }
  0x53   : > { %1006 = vrot.lane.b32.xlu0 %v1129_v8, %s1775_s28 }
  0x56   : > { %945 = vrot.lane.b32.xlu1 %v1155_v3, %s1777_s30 }
  0x57   : > { %915 = vrot.lane.b32.xlu0 %v1879_v4, %s1776_s29 }
  0x5a   : > { %1043 = vrot.lane.b32.xlu1 %v1162_v7, %s1773_s26 }
  0x5b   : > { %947 = vrot.lane.b32.xlu0 %v1130_v6, %s1777_s30 }
  0x5e   : > { %1075 = vrot.lane.b32.xlu1 %v1879_v4, %s1772_s17 }
  0x5f   : > { %1045 = vrot.lane.b32.xlu0 %v1031_v12, %s1773_s26  ;;  %s1790_s26 = smov 117  }
  0x62   : > { %911 = vrot.lane.b32.xlu1 %v1155_v3, %s1776_s29 }
  0x63   : > { %1077 = vrot.lane.b32.xlu0 %v1711_v14, %s1772_s17  ;;  %s1789_s17 = smov 107  }
  0x66   : > { %850 = vrot.lane.b32.xlu1 %v1923_v13, %s1778_s6 }
  0x67   : > { %943 = vrot.lane.b32.xlu0 %v1129_v8, %s1777_s30 }
  0x6a   : > { %882 = vrot.lane.b32.xlu1 %v1872_v1, %s1779_s7 }
  0x6b   : > { %852 = vrot.lane.b32.xlu0 %v1870_v0, %s1778_s6 }
  0x6e   : > { %980 = vrot.lane.b32.xlu1 %v1162_v7, %s1774_s27 }
  0x6f   : > { %884 = vrot.lane.b32.xlu0 %v1937_v15, %s1779_s7 }
  0x72   : > { %1012 = vrot.lane.b32.xlu1 %v1879_v4, %s1775_s28 }
  0x73   : > { %982 = vrot.lane.b32.xlu0 %v968_v16, %s1774_s27  ;;  %s1791_s27 = smov 116  }
  0x76   : > { %848 = vrot.lane.b32.xlu1 %v1872_v1, %s1778_s6 }
  0x77   : > { %1014 = vrot.lane.b32.xlu0 %v1716_v17, %s1775_s28  ;;  %v716_v17 = vld [vmem:[#allocation2 + $0x10] sm:$0xf]  ;;  %s1792_s28 = smov 126  }
  0x7a   : > { %787 = vrot.lane.b32.xlu1 %v1923_v13, %s1780_s8 }
  0x7b   : > { %880 = vrot.lane.b32.xlu0 %v1950_v18, %s1779_s7 }
  0x7e   : > { %819 = vrot.lane.b32.xlu1 %v1872_v1, %s1781_s9 }
  0x7f   : > { %789 = vrot.lane.b32.xlu0 %v1870_v0, %s1780_s8 }
  0x82   : > { %917 = vrot.lane.b32.xlu1 %v1162_v7, %s1776_s29 }
  0x83   : > { %821 = vrot.lane.b32.xlu0 %v1937_v15, %s1781_s9 }
  0x86   : > { %949 = vrot.lane.b32.xlu1 %v1879_v4, %s1777_s30 }
  0x87   : > { %919 = vrot.lane.b32.xlu0 %v905_v19, %s1776_s29  ;;  %s1793_s29 = smov 118  }
  0x8a   : > { %785 = vrot.lane.b32.xlu1 %v1872_v1, %s1780_s8 }
  0x8b   : > { %951 = vrot.lane.b32.xlu0 %v1717_v20, %s1777_s30  ;;  %s1794_s30 = smov 127  }
  0x8e   : > { %724 = vrot.lane.b32.xlu1 %v1923_v13, %s1782_s10 }
  0x8f   : > { %817 = vrot.lane.b32.xlu0 %v1950_v18, %s1781_s9 }
  0x90   : > { %v1164_v21 = vpop.permute.xlu1 %1163 }
  0x91   : > { %v1168_v24 = vpop.permute.xlu0 %1167 }
  0x92   : > { %756 = vrot.lane.b32.xlu1 %v1872_v1, %s1783_s11 }
  0x93   : > { %726 = vrot.lane.b32.xlu0 %v1870_v0, %s1782_s10 }
  0x94   : > { %v1135_v23 = vpop.permute.xlu1 %1134 }
  0x95   : > { %v1982_v26 = vpop.permute.xlu0 %1104 }
  0x96   : > { %854 = vrot.lane.b32.xlu1 %v1972_v22, %s1778_s6 }
  0x97   : > { %758 = vrot.lane.b32.xlu0 %v1937_v15, %s1783_s11 }
  0x98   : > { %v1101_v25 = vpop.permute.xlu1 %1100 }
  0x99   : > { %v1990_v29 = vpop.permute.xlu0 %1041 }
  0x9a   : > { %886 = vrot.lane.b32.xlu1 %v1870_v0, %s1779_s7 }
  0x9b   : > { %856 = vrot.lane.b32.xlu0 %v842_v27, %s1778_s6 }
  0x9c   : > { %v1988_v28 = vpop.permute.xlu1 %1071 }
  0x9d   : > { %v1166_v32 = vpop.permute.xlu0 %1165 }
  0x9e   : > { %722 = vrot.lane.b32.xlu1 %v1872_v1, %s1782_s10  ;;  %v1174_v35 = vsel %vm1173_vm1, %v1164_v21, %v1166_v32  ;;  %v1175_v36 = vsel %vm1173_vm1, %v1166_v32, %v1168_v24 }
  0x9f   : > { %1182 = vst [vmem:[#allocation3 + $0x58] sm:$0xf] %v1174_v35  ;;  %1183 = vst [vmem:[#allocation3 + $0xf0] sm:$0xf] %v1175_v36  ;;  %888 = vrot.lane.b32.xlu0 %v1718_v30, %s1779_s7 }
  0xa0   : > { %v1103_v31 = vpop.permute.xlu1 %1102 }
  0xa1   : > { %v1111_v33 = vsel %vm1110_vm0, %v1101_v25, %v1103_v31  ;;  %v1112_v34 = vsel %vm1110_vm0, %v1103_v31, %v1982_v26  ;;  %v2003_v38 = vpop.permute.xlu0 %1136 }
  0xa2   : > { %1119 = vst [vmem:[#allocation3 + $0x128] sm:$0xf] %v1111_v33  ;;  %1120 = vst [vmem:[#allocation3 + $0x38] sm:$0xf] %v1112_v34  ;;  %661 = vrot.lane.b32.xlu1 %v1923_v13, %s1784_s12  ;;  %v1144_v40 = vsel %vm1142_vm3, %v1135_v23, %v2003_v38 }
  0xa3   : > { %1152 = vst [vmem:[#allocation3 + $0x38] sm:$0xf0] %v1144_v40  ;;  %754 = vrot.lane.b32.xlu0 %v1950_v18, %s1783_s11 }
  0xa4   : > { %v1040_v37 = vpop.permute.xlu1 %1039 }
  0xa5   : > { %v1049_v39 = vsel %vm1047_vm2, %v1040_v37, %v1990_v29  ;;  %v1133_v42 = vpop.permute.xlu0 %1132 }
  0xa6   : > { %1057 = vst [vmem:[#allocation3 + $0x78] sm:$0xf] %v1049_v39  ;;  %693 = vrot.lane.b32.xlu1 %v1872_v1, %s1785_s13  ;;  %v1143_v44 = vsel %vm1142_vm3, %v1133_v42, %v1135_v23  ;;  %v1240_v45 = vld [vmem:[#allocation3 + $0xf0] sm:$0xf]  ;;  %v1239_v46 = vld [vmem:[#allocation3 + $0x58] sm:$0xf] }
  0xa7   : > { %1151 = vst [vmem:[#allocation3 + $0x128] sm:$0xf0] %v1143_v44  ;;  %1628 = vmatprep.subr.msk.mxu0 %vm1246_vm4, %v1240_v45  ;;  %663 = vrot.lane.b32.xlu0 %v1870_v0, %s1784_s12 }
  0xa8   : > { %v1170_v41 = vpop.permute.xlu1 %1169  ;;  %1629 = vmatpush1.msk.msra.mxu0 %vm1246_vm4, %v1239_v46 }
  0xa9   : > { %v1176_v43 = vsel %vm1173_vm1, %v1168_v24, %v1170_v41  ;;  %v2021_v48 = vpop.permute.xlu0 %1073  ;;  %v1720_v24 = vld [vmem:[#allocation2 + $0x10] ss:$0 sps:$4 sm:$0xff]  }
  0xaa   : > { %1184 = vst [vmem:[#allocation3 + $0x30] sm:$0xf] %v1176_v43  ;;  %791 = vrot.lane.b32.xlu1 %v1972_v22, %s1780_s8  ;;  %v1081_v50 = vsel %vm1079_vm5, %v1988_v28, %v2021_v48  ;;  %v1236_v51 = vld [vmem:[#allocation3 + $0x38] sm:$0xff]  ;;  %v653_v43 = vld [vmem:[#allocation2 + $0x10] sm:$0xf] }
  0xab   : > { %1089 = vst [vmem:[#allocation3 + $0x78] sm:$0xf0] %v1081_v50  ;;  %1265 = vmatprep.subr.mxu0 %v1236_v51  ;;  %695 = vrot.lane.b32.xlu0 %v1937_v15, %s1785_s13 }
  0xac   : > { %v1038_v47 = vpop.permute.xlu1 %1037 }
  0xad   : > { %v1048_v49 = vsel %vm1047_vm2, %v1038_v47, %v1040_v37  ;;  %v1172_v54 = vpop.permute.xlu0 %1171 }
  0xae   : > { %1056 = vst [vmem:[#allocation3 + $0x70] sm:$0xf] %v1048_v49  ;;  %823 = vrot.lane.b32.xlu1 %v1870_v0, %s1781_s9  ;;  %v1177_v55 = vsel %vm1173_vm1, %v1170_v41, %v1172_v54  ;;  %v1235_v56 = vld [vmem:[#allocation3 + $0x128] sm:$0xff]  ;;  %vm701_vm1 = vcmask 211968  }
  0xaf   : > { %1185 = vst [vmem:[#allocation3 + $0x198] sm:$0xf] %v1177_v55  ;;  %1266 = vmatpush1.msra.mxu0 %v1235_v56  ;;  %793 = vrot.lane.b32.xlu0 %v779_v52, %s1780_s8  ;;  %s1624_s8 = sshll.u32 %s2359_s19, 3 }
  0xb0   : > { %v977_v53 = vpop.permute.xlu1 %976 }
  0xb1   : > { %v1070_v59 = vpop.permute.xlu0 %1069  ;;  %v1241_v5 = vld [vmem:[#allocation3 + $0x30] sm:$0xf] }
  0xb2   : > { %659 = vrot.lane.b32.xlu1 %v1872_v1, %s1784_s12  ;;  %v1080_v60 = vsel %vm1079_vm5, %v1070_v59, %v1988_v28  ;;  %v1232_v61 = vld [vmem:[#allocation3 + $0x78] sm:$0xff] }
  0xb3   : > { %1088 = vst [vmem:[#allocation3 + $0x70] sm:$0xf0] %v1080_v60  ;;  %1267 = vmatprep.subr.mxu0 %v1232_v61  ;;  %825 = vrot.lane.b32.xlu0 %v1719_v57, %s1781_s9  ;;  %s335_s9 = sadd.s32 %s1624_s8, %s2363_s25 }
  0xb4   : > { %v1009_v58 = vpop.permute.xlu1 %1008 }
  0xb5   : > { %v2040_v63 = vpop.permute.xlu0 %978 }
  0xb6   : > { %598 = vrot.lane.b32.xlu1 %v1923_v13, %s1786_s14  ;;  %v986_v3 = vsel %vm984_vm6, %v977_v53, %v2040_v63  ;;  %v1242_v4 = vld [vmem:[#allocation3 + $0x198] sm:$0xf] }
  0xb7   : > { %994 = vst [vmem:[#allocation3 + $0x100] sm:$0xf] %v986_v3  ;;  %1631 = vmatprep.subr.msk.mxu1 %vm1246_vm4, %v1242_v4  ;;  %691 = vrot.lane.b32.xlu0 %v1950_v18, %s1785_s13 }
  0xb8   : > { %v1107_v62 = vpop.permute.xlu1 %1106  ;;  %1632 = vmatpush1.msk.msra.mxu1 %vm1246_vm4, %v1241_v5  ;;  %v590_v5 = vld [vmem:[#allocation2 + $0x10] sm:$0xf]  ;;  %vm543_vm4 = vcmask 883712  }
  0xb9   : > { %v1113_v2 = vsel %vm1110_vm0, %v1982_v26, %v1107_v62  ;;  %v2052_v7 = vpop.permute.xlu0 %1010 }
  0xba   : > { %1121 = vst [vmem:[#allocation3 + $0x88] sm:$0xf] %v1113_v2  ;;  %630 = vrot.lane.b32.xlu1 %v1872_v1, %s1787_s15  ;;  %v1018_v9 = vsel %vm1016_vm7, %v1009_v58, %v2052_v7  ;;  %v1231_v10 = vld [vmem:[#allocation3 + $0x70] sm:$0xff] }
  0xbb   : > { %1026 = vst [vmem:[#allocation3 + $0x100] sm:$0xf0] %v1018_v9  ;;  %1268 = vmatpush1.msra.mxu0 %v1231_v10  ;;  %600 = vrot.lane.b32.xlu0 %v1870_v0, %s1786_s14  ;;  %v1722_v10 = vld [vmem:[#allocation2 + $0x10] ss:$0 sps:$4 sm:$0xff]  }
  0xbc   : > { %v1139_v6 = vpop.permute.xlu1 %1138 }
  0xbd   : > { %v1145_v8 = vsel %vm1142_vm3, %v2003_v38, %v1139_v6  ;;  %v1109_v12 = vpop.permute.xlu0 %1108 }
  0xbe   : > { %1153 = vst [vmem:[#allocation3 + $0x88] sm:$0xf0] %v1145_v8  ;;  %728 = vrot.lane.b32.xlu1 %v1972_v22, %s1782_s10  ;;  %v1114_v16 = vsel %vm1110_vm0, %v1107_v62, %v1109_v12  ;;  %vm669_vm0 = vcmask 220160  }
  0xbf   : > { %1122 = vst [vmem:[#allocation3 + $0x170] sm:$0xf] %v1114_v16  ;;  %632 = vrot.lane.b32.xlu0 %v1937_v15, %s1787_s15 }
  0xc0   : > { %v975_v11 = vpop.permute.xlu1 %974 }
  0xc1   : > { %v985_v14 = vsel %vm984_vm6, %v975_v11, %v977_v53  ;;  %v1141_v20 = vpop.permute.xlu0 %1140 }
  0xc2   : > { %993 = vst [vmem:[#allocation3 + $0x10] sm:$0xf] %v985_v14  ;;  %760 = vrot.lane.b32.xlu1 %v1870_v0, %s1783_s11  ;;  %v1146_v21 = vsel %vm1142_vm3, %v1139_v6, %v1141_v20  ;;  %v1228_v23 = vld [vmem:[#allocation3 + $0x100] sm:$0xff]  ;;  %vm638_vm3 = vcmask 228352  }
  0xc3   : > { %1154 = vst [vmem:[#allocation3 + $0x170] sm:$0xf0] %v1146_v21  ;;  %1269 = vmatprep.subr.mxu0 %v1228_v23  ;;  %730 = vrot.lane.b32.xlu0 %v716_v17, %s1782_s10  ;;  %s1625_s10 = sshll.u32 %s335_s9, 3 }
  0xc4   : > { %v914_v19 = vpop.permute.xlu1 %913 }
  0xc5   : > { %v1007_v26 = vpop.permute.xlu0 %1006  ;;  %v1237_v34 = vld [vmem:[#allocation3 + $0x88] sm:$0xff] }
  0xc6   : > { %596 = vrot.lane.b32.xlu1 %v1872_v1, %s1786_s14  ;;  %v1017_v27 = vsel %vm1016_vm7, %v1007_v26, %v1009_v58 }
  0xc7   : > { %1025 = vst [vmem:[#allocation3 + $0x10] sm:$0xf0] %v1017_v27  ;;  %762 = vrot.lane.b32.xlu0 %v1720_v24, %s1783_s11 }
  0xc8   : > { %v946_v25 = vpop.permute.xlu1 %945 }
  0xc9   : > { %v2076_v30 = vpop.permute.xlu0 %915 }
  0xca   : > { %535 = vrot.lane.b32.xlu1 %v1923_v13, %s1788_s16  ;;  %v923_v32 = vsel %vm921_vm8, %v914_v19, %v2076_v30  ;;  %v1238_v33 = vld [vmem:[#allocation3 + $0x170] sm:$0xff] }
  0xcb   : > { %931 = vst [vmem:[#allocation3 + $0xa8] sm:$0xf] %v923_v32  ;;  %1336 = vmatprep.subr.mxu1 %v1238_v33  ;;  %628 = vrot.lane.b32.xlu0 %v1950_v18, %s1787_s15  ;;  %v527_v33 = vld [vmem:[#allocation2 + $0x10] sm:$0xf] }
  0xcc   : > { %v1044_v28 = vpop.permute.xlu1 %1043  ;;  %1337 = vmatpush1.msra.mxu1 %v1237_v34 }
  0xcd   : > { %v1050_v31 = vsel %vm1047_vm2, %v1990_v29, %v1044_v28  ;;  %v2086_v36 = vpop.permute.xlu0 %947 }
  0xce   : > { %1058 = vst [vmem:[#allocation3 + $0xa0] sm:$0xf] %v1050_v31  ;;  %567 = vrot.lane.b32.xlu1 %v1872_v1, %s1789_s17  ;;  %v955_v37 = vsel %vm953_vm9, %v946_v25, %v2086_v36  ;;  %v1227_v38 = vld [vmem:[#allocation3 + $0x10] sm:$0xff] }
  0xcf   : > { %963 = vst [vmem:[#allocation3 + $0xa8] sm:$0xf0] %v955_v37  ;;  %1270 = vmatpush1.msra.mxu0 %v1227_v38  ;;  %537 = vrot.lane.b32.xlu0 %v1870_v0, %s1788_s16 }
  0xd0   : > { %v1076_v35 = vpop.permute.xlu1 %1075 }
  0xd1   : > { %v1082_v29 = vsel %vm1079_vm5, %v2021_v48, %v1076_v35  ;;  %v1046_v40 = vpop.permute.xlu0 %1045  ;;  %v1721_v48 = vld [vmem:[#allocation2 + $0x10] ss:$0 sps:$4 sm:$0xff]  }
  0xd2   : > { %1090 = vst [vmem:[#allocation3 + $0xa0] sm:$0xf0] %v1082_v29  ;;  %665 = vrot.lane.b32.xlu1 %v1972_v22, %s1784_s12  ;;  %v1051_v42 = vsel %vm1047_vm2, %v1044_v28, %v1046_v40  ;;  %vm606_vm2 = vcmask 867328  }
  0xd3   : > { %1059 = vst [vmem:[#allocation3 + $0x158] sm:$0xf] %v1051_v42  ;;  %569 = vrot.lane.b32.xlu0 %v1937_v15, %s1789_s17 }
  0xd4   : > { %v912_v39 = vpop.permute.xlu1 %911 }
  0xd5   : > { %v922_v41 = vsel %vm921_vm8, %v912_v39, %v914_v19  ;;  %v1078_v45 = vpop.permute.xlu0 %1077  ;;  %v1723_v39 = vld [vmem:[#allocation2 + $0x10] ss:$0 sps:$4 sm:$0xff]  }
  0xd6   : > { %930 = vst [vmem:[#allocation3 + $0x40] sm:$0xf] %v922_v41  ;;  %697 = vrot.lane.b32.xlu1 %v1870_v0, %s1785_s13  ;;  %v1083_v46 = vsel %vm1079_vm5, %v1076_v35, %v1078_v45  ;;  %v1224_v47 = vld [vmem:[#allocation3 + $0xa8] sm:$0xff]  ;;  %v355_v35 = vld [vmem:[#allocation2] sm:$0xff]  ;;  %vm575_vm5 = vcmask 875520  }
  0xd7   : > { %1091 = vst [vmem:[#allocation3 + $0x158] sm:$0xf0] %v1083_v46  ;;  %1271 = vmatprep.subr.mxu0 %v1224_v47  ;;  %667 = vrot.lane.b32.xlu0 %v653_v43, %s1784_s12  ;;  %v359_v29 = vcombine.high %v355_v35, %v355_v35  ;;  %363 = vst [vmem:[#allocation3 + $0xb0] sm:$0xf] %v355_v35 }
  0xd8   : > { %v851_v44 = vpop.permute.xlu1 %850 }
  0xd9   : > { %v944_v50 = vpop.permute.xlu0 %943  ;;  %v1233_v57 = vld [vmem:[#allocation3 + $0xa0] sm:$0xff]  ;;  %364 = vst [vmem:[#allocation3 + $0x1b0] sm:$0xf] %v359_v29 }
  0xda   : > { %533 = vrot.lane.b32.xlu1 %v1872_v1, %s1788_s16  ;;  %v954_v51 = vsel %vm953_vm9, %v944_v50, %v946_v25 }
  0xdb   : > { %962 = vst [vmem:[#allocation3 + $0x40] sm:$0xf0] %v954_v51  ;;  %699 = vrot.lane.b32.xlu0 %v1721_v48, %s1785_s13  ;;  %s337_s13 = scalar_lea.vmem %s2346_s4, %s1625_s10 }
  0xdc   : > { %v883_v49 = vpop.permute.xlu1 %882 }
  0xdd   : > { %v2110_v53 = vpop.permute.xlu0 %852 }
  0xde   : > { %472 = vrot.lane.b32.xlu1 %v1923_v13, %s1790_s26  ;;  %v860_v55 = vsel %vm858_vm10, %v851_v44, %v2110_v53  ;;  %v1234_v56 = vld [vmem:[#allocation3 + $0x158] sm:$0xff] }
  0xdf   : > { %868 = vst [vmem:[#allocation3 + $0x68] sm:$0xf] %v860_v55  ;;  %1338 = vmatprep.subr.mxu1 %v1234_v56  ;;  %565 = vrot.lane.b32.xlu0 %v1950_v18, %s1789_s17 }
  0xe0   : > { %v981_v52 = vpop.permute.xlu1 %980  ;;  %1339 = vmatpush1.msra.mxu1 %v1233_v57 }
  0xe1   : > { %v987_v54 = vsel %vm984_vm6, %v2040_v63, %v981_v52  ;;  %v2120_v59 = vpop.permute.xlu0 %884 }
  0xe2   : > { %995 = vst [vmem:[#allocation3 + $0x160] sm:$0xf] %v987_v54  ;;  %504 = vrot.lane.b32.xlu1 %v1872_v1, %s1791_s27  ;;  %v892_v61 = vsel %vm890_vm11, %v883_v49, %v2120_v59  ;;  %v1223_v62 = vld [vmem:[#allocation3 + $0x40] sm:$0xff] }
  0xe3   : > { %900 = vst [vmem:[#allocation3 + $0x68] sm:$0xf0] %v892_v61  ;;  %1272 = vmatpush1.msra.mxu0 %v1223_v62  ;;  %474 = vrot.lane.b32.xlu0 %v1870_v0, %s1790_s26  ;;  %v356_v61 = vld [vmem:[#allocation2 + $0x8] sm:$0xff] }
  0xe4   : > { %v1013_v58 = vpop.permute.xlu1 %1012  ;;  %365 = vst [vmem:[#allocation3 + $0xd8] sm:$0xf] %v356_v61 }
  0xe5   : > { %v1019_v60 = vsel %vm1016_vm7, %v2052_v7, %v1013_v58  ;;  %v983_v2 = vpop.permute.xlu0 %982 }
  0xe6   : > { %1027 = vst [vmem:[#allocation3 + $0x160] sm:$0xf0] %v1019_v60  ;;  %602 = vrot.lane.b32.xlu1 %v1972_v22, %s1786_s14  ;;  %v988_v4 = vsel %vm984_vm6, %v981_v52, %v983_v2  ;;  %vm480_vm6 = vcmask 957440  }
  0xe7   : > { %996 = vst [vmem:[#allocation3 + $0x20] sm:$0xf] %v988_v4  ;;  %506 = vrot.lane.b32.xlu0 %v1937_v15, %s1791_s27  ;;  %v1795_v4 = vmov 0.0  }
  0xe8   : > { %v849_v63 = vpop.permute.xlu1 %848  ;;  %1323 = vmatprep.mubr.f32.mxu0 %v1795_v4  ;;  %1394 = vmatprep.mubr.f32.mxu1 %v1795_v4 }
  0xe9   : > { %v859_v3 = vsel %vm858_vm10, %v849_v63, %v851_v44  ;;  %v1015_v7 = vpop.permute.xlu0 %1014 }
  0xea   : > { %867 = vst [vmem:[#allocation3] sm:$0xf] %v859_v3  ;;  %634 = vrot.lane.b32.xlu1 %v1870_v0, %s1787_s15  ;;  %v1020_v8 = vsel %vm1016_vm7, %v1013_v58, %v1015_v7  ;;  %v1220_v9 = vld [vmem:[#allocation3 + $0x68] sm:$0xff]  ;;  %v1724_v58 = vld [vmem:[#allocation2 + $0x10] ss:$0 sps:$4 sm:$0xff]   ;;  %vm512_vm7 = vcmask 949248  }
  0xeb   : > { %1028 = vst [vmem:[#allocation3 + $0x20] sm:$0xf0] %v1020_v8  ;;  %1273 = vmatprep.subr.mxu0 %v1220_v9  ;;  %604 = vrot.lane.b32.xlu0 %v590_v5, %s1786_s14  ;;  %v1725_v3 = vld [vmem:[#allocation2 + $0x10] ss:$0 sps:$4 sm:$0xff]  }
  0xec   : > { %v788_v6 = vpop.permute.xlu1 %787  ;;  %v1726_v7 = vld [vmem:[#allocation2 + $0x10] ss:$0 sps:$4 sm:$0xff]  }
  0xed   : > { %v881_v12 = vpop.permute.xlu0 %880 }
  0xee   : > { %470 = vrot.lane.b32.xlu1 %v1872_v1, %s1790_s26  ;;  %v891_v14 = vsel %vm890_vm11, %v881_v12, %v883_v49 }
  0xef   : > { %899 = vst [vmem:[#allocation3] sm:$0xf0] %v891_v14  ;;  %636 = vrot.lane.b32.xlu0 %v1722_v10, %s1787_s15 }
  0xf0   : > { %v820_v11 = vpop.permute.xlu1 %819 }
  0xf1   : > { %v2144_v17 = vpop.permute.xlu0 %789 }
  0xf2   : > { %409 = vrot.lane.b32.xlu1 %v1923_v13, %s1792_s28  ;;  %v797_v20 = vsel %vm795_vm12, %v788_v6, %v2144_v17  ;;  %v1230_v21 = vld [vmem:[#allocation3 + $0x20] sm:$0xff] }
  0xf3   : > { %805 = vst [vmem:[#allocation3 + $0xc0] sm:$0xf] %v797_v20  ;;  %1340 = vmatprep.subr.mxu1 %v1230_v21  ;;  %502 = vrot.lane.b32.xlu0 %v1950_v18, %s1791_s27  ;;  %v1229_v13 = vld [vmem:[#allocation3 + $0x160] sm:$0xff] }
  0xf4   : > { %v918_v16 = vpop.permute.xlu1 %917  ;;  %1341 = vmatpush1.msra.mxu1 %v1229_v13 }
  0xf5   : > { %v924_v19 = vsel %vm921_vm8, %v2076_v30, %v918_v16  ;;  %v2154_v24 = vpop.permute.xlu0 %821 }
  0xf6   : > { %932 = vst [vmem:[#allocation3 + $0xd0] sm:$0xf] %v924_v19  ;;  %441 = vrot.lane.b32.xlu1 %v1872_v1, %s1793_s29  ;;  %v829_v26 = vsel %vm827_vm13, %v820_v11, %v2154_v24  ;;  %v1219_v27 = vld [vmem:[#allocation3] sm:$0xff] }
  0xf7   : > { %837 = vst [vmem:[#allocation3 + $0xc0] sm:$0xf0] %v829_v26  ;;  %1274 = vmatpush1.msra.mxu0 %v1219_v27  ;;  %411 = vrot.lane.b32.xlu0 %v1870_v0, %s1792_s28 }
  0xf8   : > { %v950_v23 = vpop.permute.xlu1 %949 }
  0xf9   : > { %v956_v25 = vsel %vm953_vm9, %v2086_v36, %v950_v23  ;;  %v920_v30 = vpop.permute.xlu0 %919 }
  0xfa   : > { %964 = vst [vmem:[#allocation3 + $0xd0] sm:$0xf0] %v956_v25  ;;  %539 = vrot.lane.b32.xlu1 %v1972_v22, %s1788_s16  ;;  %v925_v32 = vsel %vm921_vm8, %v918_v16, %v920_v30  ;;  %vm417_vm8 = vcmask 1031168  }
  0xfb   : > { %933 = vst [vmem:[#allocation3 + $0x1a0] sm:$0xf] %v925_v32  ;;  %443 = vrot.lane.b32.xlu0 %v1937_v15, %s1793_s29 }
  0xfc   : > { %v786_v28 = vpop.permute.xlu1 %785 }
  0xfd   : > { %v796_v31 = vsel %vm795_vm12, %v786_v28, %v788_v6  ;;  %v952_v36 = vpop.permute.xlu0 %951 }
  0xfe   : > { %804 = vst [vmem:[#allocation3 + $0x90] sm:$0xf] %v796_v31  ;;  %571 = vrot.lane.b32.xlu1 %v1870_v0, %s1789_s17  ;;  %v957_v37 = vsel %vm953_vm9, %v950_v23, %v952_v36  ;;  %v1216_v38 = vld [vmem:[#allocation3 + $0xc0] sm:$0xff]  ;;  %vm449_vm9 = vcmask 965632  }
  0xff   : > { %965 = vst [vmem:[#allocation3 + $0x1a0] sm:$0xf0] %v957_v37  ;;  %1275 = vmatprep.subr.mxu0 %v1216_v38  ;;  %541 = vrot.lane.b32.xlu0 %v527_v33, %s1788_s16  ;;  %s327_s16 = scalar_lea.vmem %s2345_s3, %s2363_s25  ;;  %s1626_s25 = sshll.u32 %s2359_s19, 1 }
 0x100   : > { %v725_v34 = vpop.permute.xlu1 %724 }
 0x101   : > { %v818_v41 = vpop.permute.xlu0 %817 }
 0x102   : > { %407 = vrot.lane.b32.xlu1 %v1872_v1, %s1792_s28  ;;  %v828_v42 = vsel %vm827_vm13, %v818_v41, %v820_v11 }
 0x103   : > { %836 = vst [vmem:[#allocation3 + $0x90] sm:$0xf0] %v828_v42  ;;  %573 = vrot.lane.b32.xlu0 %v1723_v39, %s1789_s17  ;;  %s344_s17 = sadd.s32 %s1626_s25, %s2365_s18 }
 0x104   : > { %v757_v40 = vpop.permute.xlu1 %756 }
 0x105   : > { %v2178_v44 = vpop.permute.xlu0 %726 }
 0x106   : > { %378 = vrot.lane.b32.xlu1 %v1872_v1, %s1794_s30  ;;  %v734_v46 = vsel %vm732_vm14, %v725_v34, %v2178_v44  ;;  %v1226_v47 = vld [vmem:[#allocation3 + $0x1a0] sm:$0xff]  ;;  %v1225_v1 = vld [vmem:[#allocation3 + $0xd0] sm:$0xff] }
 0x107   : > { %742 = vst [vmem:[#allocation3 + $0xf8] sm:$0xf] %v734_v46  ;;  %1342 = vmatprep.subr.mxu1 %v1226_v47  ;;  %439 = vrot.lane.b32.xlu0 %v1950_v18, %s1793_s29 }
 0x108   : > { %v855_v43 = vpop.permute.xlu1 %854  ;;  %1343 = vmatpush1.msra.mxu1 %v1225_v1 }
 0x109   : > { %v861_v45 = vsel %vm858_vm10, %v2110_v53, %v855_v43  ;;  %v2188_v49 = vpop.permute.xlu0 %758  ;;  %v464_v53 = vld [vmem:[#allocation2 + $0x10] sm:$0xf] }
 0x10a   : > { %869 = vst [vmem:[#allocation3 + $0x148] sm:$0xf] %v861_v45  ;;  %476 = vrot.lane.b32.xlu1 %v1972_v22, %s1790_s26  ;;  %v766_v51 = vsel %vm764_vm15, %v757_v40, %v2188_v49  ;;  %v1215_v52 = vld [vmem:[#allocation3 + $0x90] sm:$0xff] }
 0x10b   : > { %774 = vst [vmem:[#allocation3 + $0xf8] sm:$0xf0] %v766_v51  ;;  %1276 = vmatpush1.msra.mxu0 %v1215_v52  ;;  %380 = vrot.lane.b32.xlu0 %v1937_v15, %s1794_s30  ;;  %v360_v15 = vcombine.high %v356_v61, %v356_v61 }
 0x10c   : > { %v887_v48 = vpop.permute.xlu1 %886 }
 0x10d   : > { %v893_v50 = vsel %vm890_vm11, %v2120_v59, %v887_v48  ;;  %v857_v55 = vpop.permute.xlu0 %856  ;;  %v401_v59 = vld [vmem:[#allocation2 + $0x10] sm:$0xf]  ;;  %366 = vst [vmem:[#allocation3 + $0x18] sm:$0xf] %v360_v15 }
 0x10e   : > { %901 = vst [vmem:[#allocation3 + $0x148] sm:$0xf0] %v893_v50  ;;  %508 = vrot.lane.b32.xlu1 %v1870_v0, %s1791_s27  ;;  %v862_v57 = vsel %vm858_vm10, %v855_v43, %v857_v55  ;;  %vm386_vm10 = vcmask 1039360  }
 0x10f   : > { %870 = vst [vmem:[#allocation3 + $0x8] sm:$0xf] %v862_v57  ;;  %478 = vrot.lane.b32.xlu0 %v464_v53, %s1790_s26  ;;  %s1627_s26 = sshll.u32 %s344_s17, 3 }
 0x110   : > { %v723_v54 = vpop.permute.xlu1 %722 }
 0x111   : > { %v733_v56 = vsel %vm732_vm14, %v723_v54, %v725_v34  ;;  %v889_v62 = vpop.permute.xlu0 %888 }
 0x112   : > { %741 = vst [vmem:[#allocation3 + $0xe8] sm:$0xf] %v733_v56  ;;  %376 = vrot.lane.b32.xlu1 %v1950_v18, %s1794_s30  ;;  %v894_v63 = vsel %vm890_vm11, %v887_v48, %v889_v62  ;;  %v1212_v2 = vld [vmem:[#allocation3 + $0xf8] sm:$0xff]  ;;  %vm1445_vm11 = vcmask 7168  }
 0x113   : > { %902 = vst [vmem:[#allocation3 + $0x8] sm:$0xf0] %v894_v63  ;;  %1277 = vmatprep.subr.mxu0 %v1212_v2  ;;  %510 = vrot.lane.b32.xlu0 %v1724_v58, %s1791_s27 }
 0x114   : > { %v662_v60 = vpop.permute.xlu1 %661 }
 0x115   : > { %v755_v5 = vpop.permute.xlu0 %754 }
 0x116   : > { %415 = vrot.lane.b32.xlu1 %v401_v59, %s1792_s28  ;;  %v765_v6 = vsel %vm764_vm15, %v755_v5, %v757_v40 }
 0x117   : > { %773 = vst [vmem:[#allocation3 + $0xe8] sm:$0xf0] %v765_v6  ;;  %413 = vrot.lane.b32.xlu0 %v1972_v22, %s1792_s28  ;;  %v1221_v22 = vld [vmem:[#allocation3 + $0x148] sm:$0xff] }
 0x118   : > { %v694_v18 = vpop.permute.xlu1 %693 }
 0x119   : > { %v2210_v9 = vpop.permute.xlu0 %663 }
 0x11a   : > { %447 = vrot.lane.b32.xlu1 %v1725_v3, %s1793_s29  ;;  %v671_v11 = vsel %vm669_vm0, %v662_v60, %v2210_v9  ;;  %v1222_v12 = vld [vmem:[#allocation3 + $0x8] sm:$0xff] }
 0x11b   : > { %679 = vst [vmem:[#allocation3 + $0x1a8] sm:$0xf] %v671_v11  ;;  %1344 = vmatprep.subr.mxu1 %v1222_v12  ;;  %445 = vrot.lane.b32.xlu0 %v1870_v0, %s1793_s29  ;;  %s346_s29 = scalar_lea.vmem %s2347_s5, %s1627_s26 }
 0x11c   : > { %v792_v8 = vpop.permute.xlu1 %791  ;;  %1345 = vmatpush1.msra.mxu1 %v1221_v22 }
 0x11d   : > { %v798_v10 = vsel %vm795_vm12, %v2144_v17, %v792_v8  ;;  %v2219_v16 = vpop.permute.xlu0 %695 }
 0x11e   : > { %806 = vst [vmem:[#allocation3 + $0x178] sm:$0xf] %v798_v10  ;;  %384 = vrot.lane.b32.xlu1 %v1726_v7, %s1794_s30  ;;  %v703_v19 = vsel %vm701_vm1, %v694_v18, %v2219_v16  ;;  %v1211_v20 = vld [vmem:[#allocation3 + $0xe8] sm:$0xff] }
 0x11f   : > { %711 = vst [vmem:[#allocation3 + $0x1a8] sm:$0xf0] %v703_v19  ;;  %1278 = vmatpush1.msra.mxu0 %v1211_v20  ;;  %382 = vrot.lane.b32.xlu0 %v1870_v0, %s1794_s30 }
 0x120   : > { %v824_v14 = vpop.permute.xlu1 %823 }
 0x121   : > { %v830_v17 = vsel %vm827_vm13, %v2154_v24, %v824_v14  ;;  %v794_v13 = vpop.permute.xlu0 %793 }
 0x122   : > { %838 = vst [vmem:[#allocation3 + $0x178] sm:$0xf0] %v830_v17  ;;  %v799_v25 = vsel %vm795_vm12, %v792_v8, %v794_v13  ;;  %vm1447_vm12 = vcmask 15360  }
 0x123   : > { %807 = vst [vmem:[#allocation3 + $0xc8] sm:$0xf] %v799_v25 }
 0x124   : > { %v660_v21 = vpop.permute.xlu1 %659 }
 0x125   : > { %v670_v23 = vsel %vm669_vm0, %v660_v21, %v662_v60  ;;  %v826_v24 = vpop.permute.xlu0 %825 }
 0x126   : > { %678 = vst [vmem:[#allocation3 + $0x80] sm:$0xf] %v670_v23  ;;  %v831_v27 = vsel %vm827_vm13, %v824_v14, %v826_v24  ;;  %v1208_v28 = vld [vmem:[#allocation3 + $0x1a8] sm:$0xff] }
 0x127   : > { %839 = vst [vmem:[#allocation3 + $0xc8] sm:$0xf0] %v831_v27  ;;  %1279 = vmatprep.subr.mxu0 %v1208_v28 }
 0x128   : > { %v599_v26 = vpop.permute.xlu1 %598 }
 0x129   : > { %v692_v31 = vpop.permute.xlu0 %691  ;;  %v1217_v29 = vld [vmem:[#allocation3 + $0x178] sm:$0xff] }
 0x12a   : > { %v702_v32 = vsel %vm701_vm1, %v692_v31, %v694_v18 }
 0x12b   : > { %710 = vst [vmem:[#allocation3 + $0x80] sm:$0xf0] %v702_v32 }
 0x12c   : > { %v631_v30 = vpop.permute.xlu1 %630 }
 0x12d   : > { %v2231_v33 = vpop.permute.xlu0 %600 }
 0x12e   : > { %v608_v35 = vsel %vm606_vm2, %v599_v26, %v2231_v33  ;;  %v1218_v36 = vld [vmem:[#allocation3 + $0xc8] sm:$0xff] }
 0x12f   : > { %616 = vst [vmem:[#allocation3 + $0x188] sm:$0xf] %v608_v35  ;;  %1346 = vmatprep.subr.mxu1 %v1218_v36 }
 0x130   : > { %v729_v0 = vpop.permute.xlu1 %728  ;;  %1347 = vmatpush1.msra.mxu1 %v1217_v29 }
 0x131   : > { %v735_v34 = vsel %vm732_vm14, %v2178_v44, %v729_v0  ;;  %v2237_v38 = vpop.permute.xlu0 %632 }
 0x132   : > { %743 = vst [vmem:[#allocation3 + $0x190] sm:$0xf] %v735_v34  ;;  %v640_v40 = vsel %vm638_vm3, %v631_v30, %v2237_v38  ;;  %v1207_v41 = vld [vmem:[#allocation3 + $0x80] sm:$0xff] }
 0x133   : > { %648 = vst [vmem:[#allocation3 + $0x188] sm:$0xf0] %v640_v40  ;;  %1280 = vmatpush1.msra.mxu0 %v1207_v41 }
 0x134   : > { %v761_v37 = vpop.permute.xlu1 %760 }
 0x135   : > { %v767_v39 = vsel %vm764_vm15, %v2188_v49, %v761_v37  ;;  %v731_v43 = vpop.permute.xlu0 %730 }
 0x136   : > { %775 = vst [vmem:[#allocation3 + $0x190] sm:$0xf0] %v767_v39  ;;  %v736_v45 = vsel %vm732_vm14, %v729_v0, %v731_v43 }
 0x137   : > { %744 = vst [vmem:[#allocation3 + $0xb8] sm:$0xf] %v736_v45 }
 0x138   : > { %v597_v42 = vpop.permute.xlu1 %596 }
 0x139   : > { %v607_v44 = vsel %vm606_vm2, %v597_v42, %v599_v26  ;;  %v763_v47 = vpop.permute.xlu0 %762 }
 0x13a   : > { %615 = vst [vmem:[#allocation3 + $0xe0] sm:$0xf] %v607_v44  ;;  %v768_v1 = vsel %vm764_vm15, %v761_v37, %v763_v47  ;;  %v1204_v48 = vld [vmem:[#allocation3 + $0x188] sm:$0xff] }
 0x13b   : > { %776 = vst [vmem:[#allocation3 + $0xb8] sm:$0xf0] %v768_v1  ;;  %1281 = vmatprep.subr.mxu0 %v1204_v48 }
 0x13c   : > { %v536_v46 = vpop.permute.xlu1 %535 }
 0x13d   : > { %v629_v50 = vpop.permute.xlu0 %628  ;;  %v1213_v57 = vld [vmem:[#allocation3 + $0x190] sm:$0xff] }
 0x13e   : > { %v639_v51 = vsel %vm638_vm3, %v629_v50, %v631_v30 }
 0x13f   : > { %647 = vst [vmem:[#allocation3 + $0xe0] sm:$0xf0] %v639_v51 }
 0x140   : > { %v568_v49 = vpop.permute.xlu1 %567 }
 0x141   : > { %v2247_v53 = vpop.permute.xlu0 %537 }
 0x142   : > { %v545_v55 = vsel %vm543_vm4, %v536_v46, %v2247_v53  ;;  %v1214_v56 = vld [vmem:[#allocation3 + $0xb8] sm:$0xff] }
 0x143   : > { %553 = vst [vmem:[#allocation3 + $0x150] sm:$0xf] %v545_v55  ;;  %1348 = vmatprep.subr.mxu1 %v1214_v56 }
 0x144   : > { %v666_v52 = vpop.permute.xlu1 %665  ;;  %1349 = vmatpush1.msra.mxu1 %v1213_v57 }
 0x145   : > { %v672_v54 = vsel %vm669_vm0, %v2210_v9, %v666_v52  ;;  %v2253_v59 = vpop.permute.xlu0 %569 }
 0x146   : > { %680 = vst [vmem:[#allocation3 + $0x1b8] sm:$0xf] %v672_v54  ;;  %v577_v61 = vsel %vm575_vm5, %v568_v49, %v2253_v59  ;;  %v1203_v62 = vld [vmem:[#allocation3 + $0xe0] sm:$0xff] }
 0x147   : > { %585 = vst [vmem:[#allocation3 + $0x150] sm:$0xf0] %v577_v61  ;;  %1282 = vmatpush1.msra.mxu0 %v1203_v62 }
 0x148   : > { %v698_v58 = vpop.permute.xlu1 %697 }
 0x149   : > { %v704_v60 = vsel %vm701_vm1, %v2219_v16, %v698_v58  ;;  %v668_v63 = vpop.permute.xlu0 %667 }
 0x14a   : > { %712 = vst [vmem:[#allocation3 + $0x1b8] sm:$0xf0] %v704_v60  ;;  %v673_v3 = vsel %vm669_vm0, %v666_v52, %v668_v63 }
 0x14b   : > { %681 = vst [vmem:[#allocation3 + $0x28] sm:$0xf] %v673_v3 }
 0x14c   : > { %v534_v15 = vpop.permute.xlu1 %533 }
 0x14d   : > { %v544_v2 = vsel %vm543_vm4, %v534_v15, %v536_v46  ;;  %v700_v4 = vpop.permute.xlu0 %699 }
 0x14e   : > { %552 = vst [vmem:[#allocation3 + $0x120] sm:$0xf] %v544_v2  ;;  %v705_v5 = vsel %vm701_vm1, %v698_v58, %v700_v4  ;;  %v1200_v6 = vld [vmem:[#allocation3 + $0x150] sm:$0xff] }
 0x14f   : > { %713 = vst [vmem:[#allocation3 + $0x28] sm:$0xf0] %v705_v5  ;;  %1283 = vmatprep.subr.mxu0 %v1200_v6  ;;  %v1186_v6 = vld [vmem:[%s2344_s2] sm:$0xff] }
 0x150   : > { %v473_v18 = vpop.permute.xlu1 %472 }
 0x151   : > { %v566_v8 = vpop.permute.xlu0 %565  ;;  %v1209_v16 = vld [vmem:[#allocation3 + $0x1b8] sm:$0xff] }
 0x152   : > { %v576_v9 = vsel %vm575_vm5, %v566_v8, %v568_v49 }
 0x153   : > { %584 = vst [vmem:[#allocation3 + $0x120] sm:$0xf0] %v576_v9 }
 0x154   : > { %v505_v7 = vpop.permute.xlu1 %504 }
 0x155   : > { %v2263_v11 = vpop.permute.xlu0 %474 }
 0x156   : > { %v482_v22 = vsel %vm480_vm6, %v473_v18, %v2263_v11  ;;  %v1210_v14 = vld [vmem:[#allocation3 + $0x28] sm:$0xff] }
 0x157   : > { %490 = vst [vmem:[#allocation3 + $0x110] sm:$0xf] %v482_v22  ;;  %1350 = vmatprep.subr.mxu1 %v1210_v14 }
 0x158   : > { %v603_v10 = vpop.permute.xlu1 %602  ;;  %1351 = vmatpush1.msra.mxu1 %v1209_v16 }
 0x159   : > { %v609_v12 = vsel %vm606_vm2, %v2231_v33, %v603_v10  ;;  %v2269_v19 = vpop.permute.xlu0 %506 }
 0x15a   : > { %617 = vst [vmem:[#allocation3 + $0x138] sm:$0xf] %v609_v12  ;;  %v514_v21 = vsel %vm512_vm7, %v505_v7, %v2269_v19  ;;  %v1199_v13 = vld [vmem:[#allocation3 + $0x120] sm:$0xff] }
 0x15b   : > { %522 = vst [vmem:[#allocation3 + $0x110] sm:$0xf0] %v514_v21  ;;  %1284 = vmatpush1.msra.mxu0 %v1199_v13 }
 0x15c   : > { %v635_v17 = vpop.permute.xlu1 %634 }
 0x15d   : > { %v641_v20 = vsel %vm638_vm3, %v2237_v38, %v635_v17  ;;  %v605_v25 = vpop.permute.xlu0 %604 }
 0x15e   : > { %649 = vst [vmem:[#allocation3 + $0x138] sm:$0xf0] %v641_v20  ;;  %v610_v24 = vsel %vm606_vm2, %v603_v10, %v605_v25 }
 0x15f   : > { %618 = vst [vmem:[#allocation3 + $0x140] sm:$0xf] %v610_v24 }
 0x160   : > { %v471_v23 = vpop.permute.xlu1 %470 }
 0x161   : > { %v481_v26 = vsel %vm480_vm6, %v471_v23, %v473_v18  ;;  %v637_v28 = vpop.permute.xlu0 %636 }
 0x162   : > { %489 = vst [vmem:[#allocation3 + $0x180] sm:$0xf] %v481_v26  ;;  %v642_v30 = vsel %vm638_vm3, %v635_v17, %v637_v28  ;;  %v1196_v31 = vld [vmem:[#allocation3 + $0x110] sm:$0xff] }
 0x163   : > { %650 = vst [vmem:[#allocation3 + $0x140] sm:$0xf0] %v642_v30  ;;  %1285 = vmatprep.subr.mxu0 %v1196_v31 }
 0x164   : > { %v410_v27 = vpop.permute.xlu1 %409 }
 0x165   : > { %v503_v0 = vpop.permute.xlu0 %502  ;;  %v1205_v38 = vld [vmem:[#allocation3 + $0x138] sm:$0xff] }
 0x166   : > { %v513_v33 = vsel %vm512_vm7, %v503_v0, %v505_v7 }
 0x167   : > { %521 = vst [vmem:[#allocation3 + $0x180] sm:$0xf0] %v513_v33  ;;  %v1405_v33 = vld [vmem:[%s327_s16] sm:$0xf] }
 0x168   : > { %v442_v32 = vpop.permute.xlu1 %441 }
 0x169   : > { %v2279_v35 = vpop.permute.xlu0 %411 }
 0x16a   : > { %v419_v29 = vsel %vm417_vm8, %v410_v27, %v2279_v35  ;;  %v1206_v37 = vld [vmem:[#allocation3 + $0x140] sm:$0xff] }
 0x16b   : > { %427 = vst [vmem:[#allocation3 + $0x168] sm:$0xf] %v419_v29  ;;  %1352 = vmatprep.subr.mxu1 %v1206_v37 }
 0x16c   : > { %v540_v34 = vpop.permute.xlu1 %539  ;;  %1353 = vmatpush1.msra.mxu1 %v1205_v38 }
 0x16d   : > { %v546_v36 = vsel %vm543_vm4, %v2247_v53, %v540_v34  ;;  %v444_v40 = vpop.permute.xlu0 %443 }
 0x16e   : > { %554 = vst [vmem:[#allocation3 + $0x108] sm:$0xf] %v546_v36  ;;  %v451_v42 = vsel %vm449_vm9, %v442_v32, %v444_v40  ;;  %v1195_v43 = vld [vmem:[#allocation3 + $0x180] sm:$0xff] }
 0x16f   : > { %459 = vst [vmem:[#allocation3 + $0x168] sm:$0xf0] %v451_v42  ;;  %1286 = vmatpush1.msra.mxu0 %v1195_v43 }
 0x170   : > { %v572_v39 = vpop.permute.xlu1 %571 }
 0x171   : > { %v578_v41 = vsel %vm575_vm5, %v2253_v59, %v572_v39  ;;  %v542_v45 = vpop.permute.xlu0 %541 }
 0x172   : > { %586 = vst [vmem:[#allocation3 + $0x108] sm:$0xf0] %v578_v41  ;;  %v547_v47 = vsel %vm543_vm4, %v540_v34, %v542_v45 }
 0x173   : > { %555 = vst [vmem:[#allocation3 + $0x60] sm:$0xf] %v547_v47 }
 0x174   : > { %v408_v44 = vpop.permute.xlu1 %407 }
 0x175   : > { %v418_v46 = vsel %vm417_vm8, %v408_v44, %v410_v27  ;;  %v574_v48 = vpop.permute.xlu0 %573  ;;  %v1407_v27 = vlaneseq }
 0x176   : > { %426 = vst [vmem:[#allocation3 + $0x50] sm:$0xf] %v418_v46  ;;  %v579_v49 = vsel %vm575_vm5, %v572_v39, %v574_v48  ;;  %v1192_v50 = vld [vmem:[#allocation3 + $0x168] sm:$0xff] }
 0x177   : > { %587 = vst [vmem:[#allocation3 + $0x60] sm:$0xf0] %v579_v49  ;;  %1287 = vmatprep.subr.mxu0 %v1192_v50  ;;  %v1408_v30 = vshrl.u32 %v1407_v27, 7 }
 0x178   : > { %v379_v1 = vpop.permute.xlu1 %378 }
 0x179   : > { %v440_v52 = vpop.permute.xlu0 %439  ;;  %v1201_v60 = vld [vmem:[#allocation3 + $0x108] sm:$0xff]  ;;  %v1413_v0 = vsub.s32 1, %v1408_v30  ;;  %v1417_v36 = vsub.s32 2, %v1408_v30  ;;  %v1421_v38 = vsub.s32 3, %v1408_v30 }
 0x17a   : > { %v450_v54 = vsel %vm449_vm9, %v440_v52, %v442_v32  ;;  %v1409_v32 = vsub.s32 0, %v1408_v30 }
 0x17b   : > { %458 = vst [vmem:[#allocation3 + $0x50] sm:$0xf0] %v450_v54  ;;  %v1418_v39 = vrot.slane %v1405_v33, %v1417_v36  ;;  %v1422_v42 = vrot.slane %v1405_v33, %v1421_v38 }
 0x17c   : > { %v477_v51 = vpop.permute.xlu1 %476  ;;  %v1410_v34 = vrot.slane %v1405_v33, %v1409_v32 }
 0x17d   : > { %v483_v53 = vsel %vm480_vm6, %v2263_v11, %v477_v51  ;;  %v381_v56 = vpop.permute.xlu0 %380 }
 0x17e   : > { %491 = vst [vmem:[#allocation3 + $0x118] sm:$0xf] %v483_v53  ;;  %v388_v58 = vsel %vm386_vm10, %v379_v1, %v381_v56  ;;  %v1202_v59 = vld [vmem:[#allocation3 + $0x60] sm:$0xff] }
 0x17f   : > { %396 = vst [vmem:[#allocation3 + $0x1b0] sm:$0xf0] %v388_v58  ;;  %1354 = vmatprep.subr.mxu1 %v1202_v59 }
 0x180   : > { %v509_v55 = vpop.permute.xlu1 %508  ;;  %1355 = vmatpush1.msra.mxu1 %v1201_v60 }
 0x181   : > { %v515_v57 = vsel %vm512_vm7, %v2269_v19, %v509_v55  ;;  %v479_v62 = vpop.permute.xlu0 %478 }
 0x182   : > { %523 = vst [vmem:[#allocation3 + $0x118] sm:$0xf0] %v515_v57  ;;  %v484_v63 = vsel %vm480_vm6, %v477_v51, %v479_v62  ;;  %v1191_v2 = vld [vmem:[#allocation3 + $0x50] sm:$0xff] }
 0x183   : > { %492 = vst [vmem:[#allocation3 + $0x98] sm:$0xf] %v484_v63  ;;  %1288 = vmatpush1.msra.mxu0 %v1191_v2 }
 0x184   : > { %v377_v61 = vpop.permute.xlu1 %376 }
 0x185   : > { %v387_v15 = vsel %vm386_vm10, %v377_v61, %v379_v1  ;;  %v511_v18 = vpop.permute.xlu0 %510 }
 0x186   : > { %395 = vst [vmem:[#allocation3 + $0xb0] sm:$0xf0] %v387_v15  ;;  %v516_v4 = vsel %vm512_vm7, %v509_v55, %v511_v18  ;;  %v1188_v5 = vld [vmem:[#allocation3 + $0x1b0] sm:$0xff] }
 0x187   : > { %524 = vst [vmem:[#allocation3 + $0x98] sm:$0xf0] %v516_v4  ;;  %1289 = vmatprep.subr.mxu0 %v1188_v5 }
 0x188   : > { %v416_v3 = vpop.permute.xlu1 %415 }
 0x189   : > { %v414_v7 = vpop.permute.xlu0 %413  ;;  %v1197_v17 = vld [vmem:[#allocation3 + $0x118] sm:$0xff] }
 0x18a   : > { %v420_v10 = vsel %vm417_vm8, %v2279_v35, %v414_v7  ;;  %v421_v11 = vsel %vm417_vm8, %v414_v7, %v416_v3  ;;  %v1414_v35 = vrot.slane %v1405_v33, %v1413_v0 }
 0x18b   : > { %428 = vst [vmem:[#allocation3 + $0x130] sm:$0xf] %v420_v10  ;;  %429 = vst [vmem:[#allocation3 + $0x48] sm:$0xf] %v421_v11 }
 0x18c   : > { %v448_v8 = vpop.permute.xlu1 %447 }
 0x18d   : > { %v1187_v9 = vld [vmem:[#allocation3 + $0xb0] sm:$0xff]  ;;  %v446_v12 = vpop.permute.xlu0 %445 }
 0x18e   : > { %1290 = vmatpush1.msra.mxu0 %v1187_v9  ;;  %v452_v22 = vsel %vm449_vm9, %v444_v40, %v446_v12  ;;  %v453_v14 = vsel %vm449_vm9, %v446_v12, %v448_v8  ;;  %v1198_v16 = vld [vmem:[#allocation3 + $0x98] sm:$0xff] }
 0x18f   : > { %1630 = vmatmul.mubr.msk.f32.vlgmr.msra.gmra.mxu0 %vm543_vm4, %v1186_v6  ;;  %460 = vst [vmem:[#allocation3 + $0x130] sm:$0xf0] %v452_v22  ;;  %461 = vst [vmem:[#allocation3 + $0x48] sm:$0xf0] %v453_v14  ;;  %1356 = vmatprep.subr.mxu1 %v1198_v16 }
 0x190   : > { %v385_v19 = vpop.permute.xlu1 %384  ;;  %1357 = vmatpush1.msra.mxu1 %v1197_v17 }
 0x191   : > { %v383_v20 = vpop.permute.xlu0 %382 }
 0x192   : > { %v389_v21 = vsel %vm386_vm10, %v381_v56, %v383_v20  ;;  %v390_v13 = vsel %vm386_vm10, %v383_v20, %v385_v19 }
 0x193   : > { %397 = vst [vmem:[#allocation3 + $0xd8] sm:$0xf0] %v389_v21  ;;  %398 = vst [vmem:[#allocation3 + $0x18] sm:$0xf0] %v390_v13 }
 0x196   : > { %v1194_v23 = vld [vmem:[#allocation3 + $0x48] sm:$0xff]  ;;  %v1193_v25 = vld [vmem:[#allocation3 + $0x130] sm:$0xff] }
 0x197   : > { %1358 = vmatprep.subr.mxu1 %v1194_v23 }
 0x198   : > { %1359 = vmatpush1.msra.mxu1 %v1193_v25 }
 0x19a   : > { %v1190_v26 = vld [vmem:[#allocation3 + $0x18] sm:$0xff] }
 0x19b   : > { %v1189_v24 = vld [vmem:[#allocation3 + $0xd8] sm:$0xff]  ;;  %1360 = vmatprep.subr.mxu1 %v1190_v26 }
 0x19c   : > { %1361 = vmatpush1.msra.mxu1 %v1189_v24 }
 0x19d   : > { %1633 = vmatmul.mubr.msk.f32.vlgmr.msra.gmra.mxu1 %vm543_vm4, %v1186_v6 }
 0x24f   : > { %v1325_v28 = vpop.f32.mrf.mxu0 }
 0x250   : > { %1401 = vst [vmem:[%s337_s13] sm:$0xff] %v1325_v28  ;;  %v1427_v29 = vmul.f32 %v1410_v34, %v1325_v28 }
 0x251   : > { %v1327_v31 = vpop.f32.mrf.mxu0 }
 0x252   : > { %1402 = vst [vmem:[%s337_s13 + $0x8] sm:$0xff] %v1327_v31  ;;  %v1428_v37 = vmul.f32 %v1414_v35, %v1327_v31  ;;  %v1436_v40 = vmul.f32 %v1427_v29, %v1325_v28 }
 0x254   : > { %v1437_v41 = vmul.f32 %v1428_v37, %v1327_v31  ;;  %v1431_v44 = vadd.f32 %v1428_v37, %v1427_v29 }
 0x256   : > { %v1440_v47 = vadd.f32 %v1437_v41, %v1436_v40 }
 0x25d   : > { %v1396_v43 = vpop.f32.mrf.mxu1 }
 0x25e   : > { %1403 = vst [vmem:[%s337_s13 + $0x10] sm:$0xff] %v1396_v43  ;;  %v1429_v45 = vmul.f32 %v1418_v39, %v1396_v43 }
 0x25f   : > { %v1398_v46 = vpop.f32.mrf.mxu1 }
 0x260   : > { %v1432_v1 = vadd.f32 %v1431_v44, %v1429_v45  ;;  %v1438_v48 = vmul.f32 %v1429_v45, %v1396_v43  ;;  %1404 = vst [vmem:[%s337_s13 + $0x18] sm:$0xff] %v1398_v46  ;;  %v1430_v49 = vmul.f32 %v1422_v42, %v1398_v46 }
 0x262   : > { %v1441_v50 = vadd.f32 %v1440_v47, %v1438_v48  ;;  %v1433_v51 = vadd.f32 %v1432_v1, %v1430_v49  ;;  %v1439_v52 = vmul.f32 %v1430_v49, %v1398_v46 }
 0x264   : > { %v1442_v53 = vadd.f32 %v1441_v50, %v1439_v52  ;;  %1434 = vadd.xlane.f32.xlu0 %v1433_v51 }
 0x266   : > { %1443 = vadd.xlane.f32.xlu1 %v1442_v53 }
 0x2ed   : > { %v1435_v54 = vpop.xlane.xlu0 %1434 }
 0x2ef   : > { %v1444_v55 = vpop.xlane.xlu1 %1443 }
 0x2f0   : > { %v1446_v56 = vsel %vm1445_vm11, %v1435_v54, %v1444_v55 }
 0x2f1   : > { %1448 = vst.msk [vmem:[%s346_s29] sm:$0xff] %vm1447_vm12, %v1446_v56 }
 0x2f2 PF: > { %s16_s22 = sadd.s32 1, %s1767_s22   ;;  %s2348_s18 = smov %s1759_s20 }
 0x2f3   : > { %p13_p10 = scmp.ge.s32.totalorder %s16_s22, 6   ;;  %s2349_s19 = smov %s1763_s21 }
 0x2f4   : > { %s2350_s20 = smov %s2353_s23  ;;  %s2351_s21 = smov %s2357_s24 }
 0x2f5   :  { %15 = sbr.rel (!%p13_p10) target bundleno = 3 (0x3), region = 84 }

</bundles_post_ra>
